<compile_context>
chip_gen: v7x
topology: tpu7x:2x2x1
jax: 0.10.0
libtpu: 0.0.40
codegen_flags: <defaults>
</compile_context>

<pallas_src>
import functools

import jax
import jax.numpy as jnp
from jax import lax
from jax.experimental import pallas as pl
from jax.experimental.pallas import tpu as pltpu


def _round_up(x, m):
    return (x + m - 1) // m * m


# PyTorch gate order is [i, f, g, o]; i/f/o are sigmoid, g is tanh.
# sigmoid(x) = 0.5*(tanh(x/2) + 1): the /2 is folded into the sigmoid gates'
# weights & bias (_PRE_SCALE); the affine (_POST_A, _POST_B) is applied to the
# single tanh's output inside the kernel.
_PRE_SCALE = (0.5, 0.5, 1.0, 0.5)
_POST_A = (0.5, 0.5, 1.0, 0.5)
_POST_B = (0.5, 0.5, 0.0, 0.5)


def _lstm_kernel(x_ref, wih0_ref, b0_ref, whh0_ref, wih1_ref, whh1_ref,
                 b1_ref, pa_ref, pb_ref, wlin_ref, blin_ref,
                 out_ref,
                 xw_s,
                 *, seq, batch_pad, state_pad, mx_dtype, unroll):
    Bp = batch_pad
    Hs = state_pad
    G = 4 * Hs
    f32 = jnp.float32

    # ---- Layer-0 input projection for ALL timesteps (non-recurrent): one
    # MXU matmul into VMEM scratch.  Rows [t*Bp, (t+1)*Bp) = timestep t.
    xw_s[...] = (jnp.dot(x_ref[...], wih0_ref[...], preferred_element_type=f32)
                 + b0_ref[...])

    # ---- Hoist broadcasts out of the unrolled recurrence (JAX does not CSE
    # broadcast_in_dim; with unroll they would be re-emitted every step).
    pa = jnp.broadcast_to(pa_ref[...], (Bp, G))
    pb = jnp.broadcast_to(pb_ref[...], (Bp, G))
    b1 = jnp.broadcast_to(b1_ref[...], (Bp, G))

    def gates_to_state(pre, c_prev):
        # ONE tanh over the whole gate tile (EUP), then a per-lane affine
        # (VPU) turns the i/f/o lanes into sigmoids and leaves g as tanh.
        act = jnp.tanh(pre) * pa + pb
        i_g = act[:, 0 * Hs:1 * Hs]
        f_g = act[:, 1 * Hs:2 * Hs]
        g_g = act[:, 2 * Hs:3 * Hs]
        o_g = act[:, 3 * Hs:4 * Hs]
        c_new = f_g * c_prev + i_g * g_g
        h_new = o_g * jnp.tanh(c_new)
        return h_new, c_new

    def step(t, carry):
        h0, c0, h1, c1 = carry
        # Layer-1's recurrent dot only depends on h1(t-1): issue it before
        # layer-0's EUP-bound gate math so the MXU push overlaps the EUP.
        r1 = jnp.dot(h1.astype(mx_dtype), whh1_ref[...],
                     preferred_element_type=f32) + b1
        # Layer 0: precomputed input projection + recurrent dot.
        row = pl.multiple_of(t * Bp, Bp)
        g0 = xw_s[pl.ds(row, Bp), :] + jnp.dot(
            h0.astype(mx_dtype), whh0_ref[...], preferred_element_type=f32)
        h0, c0 = gates_to_state(g0, c0)
        # Layer 1: input dot (depends on the fresh h0) + the prefetched r1.
        g1 = r1 + jnp.dot(h0.astype(mx_dtype), wih1_ref[...],
                          preferred_element_type=f32)
        h1, c1 = gates_to_state(g1, c1)
        return h0, c0, h1, c1

    # TODO(synk): hold whh0/whh1 MXU-stationary across the unrolled steps via
    # pltpu.matmul_push_rhs / matmul_acc_lhs / matmul_pop (weight-stationary
    # win for small-batch recurrences).
    z = jnp.zeros((Bp, Hs), f32)
    _, _, h1, _ = lax.fori_loop(0, seq, step, (z, z, z, z), unroll=unroll)

    # ---- Final linear on the last timestep's top-layer hidden state.
    out_ref[...] = (jnp.dot(h1.astype(mx_dtype), wlin_ref[...],
                            preferred_element_type=f32) + blin_ref[...])


def _layout_gates(w, H, Hs):
    """Re-layout the trailing 4H gate axis so gate k occupies columns
    [k*Hs, k*Hs + H) (zero-padded to Hs), with the sigmoid gates' 0.5
    pre-activation scale folded in."""
    pad = [(0, 0)] * (w.ndim - 1) + [(0, Hs - H)]
    blocks = []
    for k in range(4):
        blocks.append(jnp.pad(w[..., k * H:(k + 1) * H] * _PRE_SCALE[k], pad))
    return jnp.concatenate(blocks, axis=-1)


def _derive_vmem_limit(footprint_bytes):
    """Footprint-derived scoped-VMEM limit, capped by the device's capacity."""
    cap = 64 * 1024 * 1024  # conservative default (v7x per-TC VMEM)
    try:
        cap = int(getattr(pltpu.get_tpu_info(), "vmem_capacity_bytes", cap))
    except Exception:
        pass
    want = 2 * footprint_bytes + (8 << 20)  # headroom for compiler temps
    return int(min(max(want, 16 << 20), (cap * 3) // 4))


def lstm_forward_pallas(x, params, hidden_dim, output_dim):
    """x: (batch, seq, input_dim) float32.  Returns (batch, output_dim) f32."""
    batch, seq, input_dim = x.shape
    H = hidden_dim
    mx_dtype = jnp.bfloat16  # MXU operand dtype; accumulation/state stay f32

    # ---- TPU-friendly padded sizes.
    Bp = _round_up(batch, 8)
    Dp = _round_up(input_dim, 8)          # no 128-padding of the tiny K dim
    # Dense gate packing when the 4 gates exactly fill lane tiles
    # (H=32 -> G=128); otherwise per-gate 128-lane padding (zero columns).
    Hs = H if (4 * H) % 128 == 0 else _round_up(H, 128)
    G = 4 * Hs
    OUTp = _round_up(output_dim, 128)

    # Time-major then flattened over (seq, batch): rows [t*Bp,(t+1)*Bp)=step t.
    x_tm = jnp.transpose(x, (1, 0, 2))                               # (S,B,D)
    x_tm = jnp.pad(x_tm, ((0, 0), (0, Bp - batch), (0, Dp - input_dim)))
    x_flat = x_tm.reshape(seq * Bp, Dp).astype(mx_dtype)

    # ---- layer 0 weights (K, G) with gate-aligned columns.
    wih0 = _layout_gates(
        jnp.pad(params["weight_ih_l0"].T, ((0, Dp - input_dim), (0, 0))),
        H, Hs).astype(mx_dtype)
    whh0 = _layout_gates(
        jnp.pad(params["weight_hh_l0"].T, ((0, Hs - H), (0, 0))),
        H, Hs).astype(mx_dtype)
    b0 = _layout_gates(
        (params["bias_ih_l0"] + params["bias_hh_l0"]).reshape(1, 4 * H), H, Hs)

    # ---- layer 1 weights, kept separate (no per-step concat in the kernel).
    wih1 = _layout_gates(
        jnp.pad(params["weight_ih_l1"].T, ((0, Hs - H), (0, 0))),
        H, Hs).astype(mx_dtype)
    whh1 = _layout_gates(
        jnp.pad(params["weight_hh_l1"].T, ((0, Hs - H), (0, 0))),
        H, Hs).astype(mx_dtype)
    b1 = _layout_gates(
        (params["bias_ih_l1"] + params["bias_hh_l1"]).reshape(1, 4 * H), H, Hs)

    # ---- per-lane affine turning the single tanh into sigmoid on i/f/o.
    post_a = jnp.concatenate(
        [jnp.full((1, Hs), a, jnp.float32) for a in _POST_A], axis=1)
    post_b = jnp.concatenate(
        [jnp.full((1, Hs), b, jnp.float32) for b in _POST_B], axis=1)

    # ---- final linear.
    wlin = jnp.pad(params["linear_w"].T,
                   ((0, Hs - H), (0, OUTp - output_dim))).astype(mx_dtype)
    blin = jnp.pad(params["linear_b"].reshape(1, -1),
                   ((0, 0), (0, OUTp - output_dim)))

    # Full unroll only while the carried state comfortably fits the vreg file.
    unroll = True if (seq <= 16 and Bp <= 32) else 4

    kernel = functools.partial(_lstm_kernel, seq=seq, batch_pad=Bp,
                               state_pad=Hs, mx_dtype=mx_dtype, unroll=unroll)

    inputs = (x_flat, wih0, b0, whh0, wih1, whh1, b1, post_a, post_b,
              wlin, blin)
    footprint = sum(int(a.size) * a.dtype.itemsize for a in inputs)
    footprint += seq * Bp * G * 4 + Bp * OUTp * 4   # scratch + output

    vmem_spec = pl.BlockSpec(memory_space=pltpu.MemorySpace.VMEM)
    out_pad = pl.pallas_call(
        kernel,
        out_shape=jax.ShapeDtypeStruct((Bp, OUTp), jnp.float32),
        in_specs=[vmem_spec] * len(inputs),
        out_specs=vmem_spec,
        scratch_shapes=[
            pltpu.VMEM((seq * Bp, G), jnp.float32),  # x @ W_ih0 + b0, all steps
        ],
        compiler_params=pltpu.CompilerParams(
            vmem_limit_bytes=_derive_vmem_limit(footprint)),
    )(*inputs)

    # TODO(synk): on v7x (2 TensorCores) add a leading batch-parallel grid axis
    # (dimension_semantics=("parallel", ...)) once Bp spans several sublane
    # tiles, and chunk the layer-0 projection over seq (grid axis 'arbitrary'
    # with persistent h/c scratch) to bound VMEM for large seq*batch.
    return out_pad[:batch, :output_dim]


# ---------------------------------------------------------------------------
# Pure-JAX f32 reference (mirrors torch.nn.LSTM semantics) for verification.
# ---------------------------------------------------------------------------
def lstm_forward_ref(x, params, hidden_dim, output_dim):
    batch, seq, _ = x.shape
    H = hidden_dim

    def run_layer(inp, wih, whh, bih, bhh):
        h = jnp.zeros((batch, H), jnp.float32)
        c = jnp.zeros((batch, H), jnp.float32)
        outs = []
        for t in range(seq):
            gates = inp[:, t, :] @ wih.T + bih + h @ whh.T + bhh
            i_g = jax.nn.sigmoid(gates[:, 0 * H:1 * H])
            f_g = jax.nn.sigmoid(gates[:, 1 * H:2 * H])
            g_g = jnp.tanh(gates[:, 2 * H:3 * H])
            o_g = jax.nn.sigmoid(gates[:, 3 * H:4 * H])
            c = f_g * c + i_g * g_g
            h = o_g * jnp.tanh(c)
            outs.append(h)
        return jnp.stack(outs, axis=1)

    out0 = run_layer(x, params["weight_ih_l0"], params["weight_hh_l0"],
                     params["bias_ih_l0"], params["bias_hh_l0"])
    out1 = run_layer(out0, params["weight_ih_l1"], params["weight_hh_l1"],
                     params["bias_ih_l1"], params["bias_hh_l1"])
    last = out1[:, -1, :]
    return last @ params["linear_w"].T + params["linear_b"]


def init_params(key, input_dim, hidden_dim, output_dim):
    """Deterministic init matching PyTorch default shapes (uniform ±1/sqrt(H))."""
    H = hidden_dim
    k = 1.0 / jnp.sqrt(jnp.float32(H))
    shapes = {
        "weight_ih_l0": (4 * H, input_dim),
        "weight_hh_l0": (4 * H, H),
        "bias_ih_l0": (4 * H,),
        "bias_hh_l0": (4 * H,),
        "weight_ih_l1": (4 * H, H),
        "weight_hh_l1": (4 * H, H),
        "bias_ih_l1": (4 * H,),
        "bias_hh_l1": (4 * H,),
    }
    params = {}
    keys = jax.random.split(key, len(shapes) + 2)
    for i, (name, shp) in enumerate(shapes.items()):
        params[name] = jax.random.uniform(keys[i], shp, jnp.float32, -k, k)
    params["linear_w"] = jax.random.uniform(keys[-2], (output_dim, H),
                                            jnp.float32, -k, k)
    params["linear_b"] = jax.random.uniform(keys[-1], (output_dim,),
                                            jnp.float32, -k, k)
    return params


if __name__ == "__main__":
    batch, seq, input_dim, hidden_dim, output_dim = 2, 8, 4, 32, 1

    key = jax.random.PRNGKey(0)
    k_x, k_p = jax.random.split(key)
    x = jax.random.normal(k_x, (batch, seq, input_dim), jnp.float32)
    params = init_params(k_p, input_dim, hidden_dim, output_dim)

    out = lstm_forward_pallas(x, params, hidden_dim, output_dim)
    out = jax.block_until_ready(out)

    ref = lstm_forward_ref(x, params, hidden_dim, output_dim)
    assert out.shape == (batch, output_dim)
    # Kernel uses bf16 MXU operands (f32 accumulation/state), so compare at a
    # bf16-appropriate tolerance against the f32 reference.
    assert jnp.allclose(out, ref, atol=2e-2, rtol=2e-2), (out, ref)

    print("KERNEL_OK")
</pallas_src>

<mosaic_0001>
module attributes {stable_mosaic.version = 11 : i64} {
  func.func @_lstm_kernel(%arg0: memref<64x8xbf16, #tpu.memory_space<vmem>>, %arg1: memref<8x128xbf16, #tpu.memory_space<vmem>>, %arg2: memref<1x128xf32, #tpu.memory_space<vmem>>, %arg3: memref<32x128xbf16, #tpu.memory_space<vmem>>, %arg4: memref<32x128xbf16, #tpu.memory_space<vmem>>, %arg5: memref<32x128xbf16, #tpu.memory_space<vmem>>, %arg6: memref<1x128xf32, #tpu.memory_space<vmem>>, %arg7: memref<1x128xf32, #tpu.memory_space<vmem>>, %arg8: memref<1x128xf32, #tpu.memory_space<vmem>>, %arg9: memref<32x128xbf16, #tpu.memory_space<vmem>>, %arg10: memref<1x128xf32, #tpu.memory_space<vmem>>, %arg11: memref<8x128xf32, #tpu.memory_space<vmem>>, %arg12: memref<64x128xf32, #tpu.memory_space<vmem>>) attributes {dimension_semantics = [], scalar_prefetch = 0 : i64, scratch_operands = 1 : i64, tpu.core_type = #tpu.core_type<tc>} {
    %c0 = arith.constant 0 : index
    %c0_0 = arith.constant 0 : index
    %0 = vector.load %arg0[%c0, %c0_0] : memref<64x8xbf16, #tpu.memory_space<vmem>>, vector<64x8xbf16>
    %c0_1 = arith.constant 0 : index
    %c0_2 = arith.constant 0 : index
    %1 = vector.load %arg1[%c0_1, %c0_2] : memref<8x128xbf16, #tpu.memory_space<vmem>>, vector<8x128xbf16>
    %cst = arith.constant dense<0.000000e+00> : vector<64x128xf32>
    %2 = tpu.matmul %0, %1, %cst {dimension_numbers = #tpu.dot_dimension_numbers<[1], [0], [0], [1], [0, 0, 1, 1], [], []>} : vector<64x8xbf16>, vector<8x128xbf16>, vector<64x128xf32> -> vector<64x128xf32>
    %c0_3 = arith.constant 0 : index
    %c0_4 = arith.constant 0 : index
    %3 = vector.load %arg2[%c0_3, %c0_4] : memref<1x128xf32, #tpu.memory_space<vmem>>, vector<1x128xf32>
    %4 = vector.broadcast %3 : vector<1x128xf32> to vector<64x128xf32>
    %5 = arith.addf %2, %4 : vector<64x128xf32>
    %c0_5 = arith.constant 0 : index
    %c0_6 = arith.constant 0 : index
    %6 = vector.load %arg12[%c0_5, %c0_6] : memref<64x128xf32, #tpu.memory_space<vmem>>, vector<64x128xf32>
    tpu.vector_store %arg12[%c0_5, %c0_6], %5 {strides = array<i32>} : memref<64x128xf32, #tpu.memory_space<vmem>>, vector<64x128xf32>,
    %c0_7 = arith.constant 0 : index
    %c0_8 = arith.constant 0 : index
    %7 = vector.load %arg7[%c0_7, %c0_8] : memref<1x128xf32, #tpu.memory_space<vmem>>, vector<1x128xf32>
    %8 = vector.shape_cast %7 : vector<1x128xf32> to vector<1x128xf32>
    %9 = vector.broadcast %8 : vector<1x128xf32> to vector<8x128xf32>
    %c0_9 = arith.constant 0 : index
    %c0_10 = arith.constant 0 : index
    %10 = vector.load %arg8[%c0_9, %c0_10] : memref<1x128xf32, #tpu.memory_space<vmem>>, vector<1x128xf32>
    %11 = vector.shape_cast %10 : vector<1x128xf32> to vector<1x128xf32>
    %12 = vector.broadcast %11 : vector<1x128xf32> to vector<8x128xf32>
    %c0_11 = arith.constant 0 : index
    %c0_12 = arith.constant 0 : index
    %13 = vector.load %arg6[%c0_11, %c0_12] : memref<1x128xf32, #tpu.memory_space<vmem>>, vector<1x128xf32>
    %14 = vector.shape_cast %13 : vector<1x128xf32> to vector<1x128xf32>
    %15 = vector.broadcast %14 : vector<1x128xf32> to vector<8x128xf32>
    %cst_13 = arith.constant 0.000000e+00 : f32
    %16 = vector.broadcast %cst_13 : f32 to vector<8x32xf32>
    %c0_i32 = arith.constant 0 : i32
    %17 = arith.truncf %16 : vector<8x32xf32> to vector<8x32xbf16>
    %c0_14 = arith.constant 0 : index
    %c0_15 = arith.constant 0 : index
    %18 = vector.load %arg5[%c0_14, %c0_15] : memref<32x128xbf16, #tpu.memory_space<vmem>>, vector<32x128xbf16>
    %cst_16 = arith.constant dense<0.000000e+00> : vector<8x128xf32>
    %19 = tpu.matmul %17, %18, %cst_16 {dimension_numbers = #tpu.dot_dimension_numbers<[1], [0], [0], [1], [0, 0, 1, 1], [], []>} : vector<8x32xbf16>, vector<32x128xbf16>, vector<8x128xf32> -> vector<8x128xf32>
    %20 = arith.addf %19, %15 : vector<8x128xf32>
    %c8_i32 = arith.constant 8 : i32
    %21 = arith.muli %c0_i32, %c8_i32 : i32
    %22 = tpu.assume_multiple %21, 8 : i32
    %23 = arith.index_cast %22 : i32 to index
    %c0_17 = arith.constant 0 : index
    %24 = vector.load %arg12[%23, %c0_17] : memref<64x128xf32, #tpu.memory_space<vmem>>, vector<8x128xf32>
    %25 = arith.truncf %16 : vector<8x32xf32> to vector<8x32xbf16>
    %c0_18 = arith.constant 0 : index
    %c0_19 = arith.constant 0 : index
    %26 = vector.load %arg3[%c0_18, %c0_19] : memref<32x128xbf16, #tpu.memory_space<vmem>>, vector<32x128xbf16>
    %cst_20 = arith.constant dense<0.000000e+00> : vector<8x128xf32>
    %27 = tpu.matmul %25, %26, %cst_20 {dimension_numbers = #tpu.dot_dimension_numbers<[1], [0], [0], [1], [0, 0, 1, 1], [], []>} : vector<8x32xbf16>, vector<32x128xbf16>, vector<8x128xf32> -> vector<8x128xf32>
    %28 = arith.addf %24, %27 : vector<8x128xf32>
    %29 = math.tanh %28 : vector<8x128xf32>
    %30 = arith.mulf %29, %9 : vector<8x128xf32>
    %31 = arith.addf %30, %12 : vector<8x128xf32>
    %32 = vector.extract_strided_slice %31 {offsets = [0, 0], sizes = [8, 32], strides = [1, 1]} : vector<8x128xf32> to vector<8x32xf32>
    %33 = vector.extract_strided_slice %31 {offsets = [0, 32], sizes = [8, 32], strides = [1, 1]} : vector<8x128xf32> to vector<8x32xf32>
    %34 = vector.extract_strided_slice %31 {offsets = [0, 64], sizes = [8, 32], strides = [1, 1]} : vector<8x128xf32> to vector<8x32xf32>
    %35 = vector.extract_strided_slice %31 {offsets = [0, 96], sizes = [8, 32], strides = [1, 1]} : vector<8x128xf32> to vector<8x32xf32>
    %36 = arith.mulf %33, %16 : vector<8x32xf32>
    %37 = arith.mulf %32, %34 : vector<8x32xf32>
    %38 = arith.addf %36, %37 : vector<8x32xf32>
    %39 = math.tanh %38 : vector<8x32xf32>
    %40 = arith.mulf %35, %39 : vector<8x32xf32>
    %41 = arith.truncf %40 : vector<8x32xf32> to vector<8x32xbf16>
    %c0_21 = arith.constant 0 : index
    %c0_22 = arith.constant 0 : index
    %42 = vector.load %arg4[%c0_21, %c0_22] : memref<32x128xbf16, #tpu.memory_space<vmem>>, vector<32x128xbf16>
    %cst_23 = arith.constant dense<0.000000e+00> : vector<8x128xf32>
    %43 = tpu.matmul %41, %42, %cst_23 {dimension_numbers = #tpu.dot_dimension_numbers<[1], [0], [0], [1], [0, 0, 1, 1], [], []>} : vector<8x32xbf16>, vector<32x128xbf16>, vector<8x128xf32> -> vector<8x128xf32>
    %44 = arith.addf %20, %43 : vector<8x128xf32>
    %45 = math.tanh %44 : vector<8x128xf32>
    %46 = arith.mulf %45, %9 : vector<8x128xf32>
    %47 = arith.addf %46, %12 : vector<8x128xf32>
    %48 = vector.extract_strided_slice %47 {offsets = [0, 0], sizes = [8, 32], strides = [1, 1]} : vector<8x128xf32> to vector<8x32xf32>
    %49 = vector.extract_strided_slice %47 {offsets = [0, 32], sizes = [8, 32], strides = [1, 1]} : vector<8x128xf32> to vector<8x32xf32>
    %50 = vector.extract_strided_slice %47 {offsets = [0, 64], sizes = [8, 32], strides = [1, 1]} : vector<8x128xf32> to vector<8x32xf32>
    %51 = vector.extract_strided_slice %47 {offsets = [0, 96], sizes = [8, 32], strides = [1, 1]} : vector<8x128xf32> to vector<8x32xf32>
    %52 = arith.mulf %49, %16 : vector<8x32xf32>
    %53 = arith.mulf %48, %50 : vector<8x32xf32>
    %54 = arith.addf %52, %53 : vector<8x32xf32>
    %55 = math.tanh %54 : vector<8x32xf32>
    %56 = arith.mulf %51, %55 : vector<8x32xf32>
    %c1_i32 = arith.constant 1 : i32
    %57 = arith.truncf %56 : vector<8x32xf32> to vector<8x32xbf16>
    %c0_24 = arith.constant 0 : index
    %c0_25 = arith.constant 0 : index
    %58 = vector.load %arg5[%c0_24, %c0_25] : memref<32x128xbf16, #tpu.memory_space<vmem>>, vector<32x128xbf16>
    %cst_26 = arith.constant dense<0.000000e+00> : vector<8x128xf32>
    %59 = tpu.matmul %57, %58, %cst_26 {dimension_numbers = #tpu.dot_dimension_numbers<[1], [0], [0], [1], [0, 0, 1, 1], [], []>} : vector<8x32xbf16>, vector<32x128xbf16>, vector<8x128xf32> -> vector<8x128xf32>
    %60 = arith.addf %59, %15 : vector<8x128xf32>
    %c8_i32_27 = arith.constant 8 : i32
    %61 = arith.muli %c1_i32, %c8_i32_27 : i32
    %62 = tpu.assume_multiple %61, 8 : i32
    %63 = arith.index_cast %62 : i32 to index
    %c0_28 = arith.constant 0 : index
    %64 = vector.load %arg12[%63, %c0_28] : memref<64x128xf32, #tpu.memory_space<vmem>>, vector<8x128xf32>
    %65 = arith.truncf %40 : vector<8x32xf32> to vector<8x32xbf16>
    %c0_29 = arith.constant 0 : index
    %c0_30 = arith.constant 0 : index
    %66 = vector.load %arg3[%c0_29, %c0_30] : memref<32x128xbf16, #tpu.memory_space<vmem>>, vector<32x128xbf16>
    %cst_31 = arith.constant dense<0.000000e+00> : vector<8x128xf32>
    %67 = tpu.matmul %65, %66, %cst_31 {dimension_numbers = #tpu.dot_dimension_numbers<[1], [0], [0], [1], [0, 0, 1, 1], [], []>} : vector<8x32xbf16>, vector<32x128xbf16>, vector<8x128xf32> -> vector<8x128xf32>
    %68 = arith.addf %64, %67 : vector<8x128xf32>
    %69 = math.tanh %68 : vector<8x128xf32>
    %70 = arith.mulf %69, %9 : vector<8x128xf32>
    %71 = arith.addf %70, %12 : vector<8x128xf32>
    %72 = vector.extract_strided_slice %71 {offsets = [0, 0], sizes = [8, 32], strides = [1, 1]} : vector<8x128xf32> to vector<8x32xf32>
    %73 = vector.extract_strided_slice %71 {offsets = [0, 32], sizes = [8, 32], strides = [1, 1]} : vector<8x128xf32> to vector<8x32xf32>
    %74 = vector.extract_strided_slice %71 {offsets = [0, 64], sizes = [8, 32], strides = [1, 1]} : vector<8x128xf32> to vector<8x32xf32>
    %75 = vector.extract_strided_slice %71 {offsets = [0, 96], sizes = [8, 32], strides = [1, 1]} : vector<8x128xf32> to vector<8x32xf32>
    %76 = arith.mulf %73, %38 : vector<8x32xf32>
    %77 = arith.mulf %72, %74 : vector<8x32xf32>
    %78 = arith.addf %76, %77 : vector<8x32xf32>
    %79 = math.tanh %78 : vector<8x32xf32>
    %80 = arith.mulf %75, %79 : vector<8x32xf32>
    %81 = arith.truncf %80 : vector<8x32xf32> to vector<8x32xbf16>
    %c0_32 = arith.constant 0 : index
    %c0_33 = arith.constant 0 : index
    %82 = vector.load %arg4[%c0_32, %c0_33] : memref<32x128xbf16, #tpu.memory_space<vmem>>, vector<32x128xbf16>
    %cst_34 = arith.constant dense<0.000000e+00> : vector<8x128xf32>
    %83 = tpu.matmul %81, %82, %cst_34 {dimension_numbers = #tpu.dot_dimension_numbers<[1], [0], [0], [1], [0, 0, 1, 1], [], []>} : vector<8x32xbf16>, vector<32x128xbf16>, vector<8x128xf32> -> vector<8x128xf32>
    %84 = arith.addf %60, %83 : vector<8x128xf32>
    %85 = math.tanh %84 : vector<8x128xf32>
    %86 = arith.mulf %85, %9 : vector<8x128xf32>
    %87 = arith.addf %86, %12 : vector<8x128xf32>
    %88 = vector.extract_strided_slice %87 {offsets = [0, 0], sizes = [8, 32], strides = [1, 1]} : vector<8x128xf32> to vector<8x32xf32>
    %89 = vector.extract_strided_slice %87 {offsets = [0, 32], sizes = [8, 32], strides = [1, 1]} : vector<8x128xf32> to vector<8x32xf32>
    %90 = vector.extract_strided_slice %87 {offsets = [0, 64], sizes = [8, 32], strides = [1, 1]} : vector<8x128xf32> to vector<8x32xf32>
    %91 = vector.extract_strided_slice %87 {offsets = [0, 96], sizes = [8, 32], strides = [1, 1]} : vector<8x128xf32> to vector<8x32xf32>
    %92 = arith.mulf %89, %54 : vector<8x32xf32>
    %93 = arith.mulf %88, %90 : vector<8x32xf32>
    %94 = arith.addf %92, %93 : vector<8x32xf32>
    %95 = math.tanh %94 : vector<8x32xf32>
    %96 = arith.mulf %91, %95 : vector<8x32xf32>
    %c2_i32 = arith.constant 2 : i32
    %97 = arith.truncf %96 : vector<8x32xf32> to vector<8x32xbf16>
    %c0_35 = arith.constant 0 : index
    %c0_36 = arith.constant 0 : index
    %98 = vector.load %arg5[%c0_35, %c0_36] : memref<32x128xbf16, #tpu.memory_space<vmem>>, vector<32x128xbf16>
    %cst_37 = arith.constant dense<0.000000e+00> : vector<8x128xf32>
    %99 = tpu.matmul %97, %98, %cst_37 {dimension_numbers = #tpu.dot_dimension_numbers<[1], [0], [0], [1], [0, 0, 1, 1], [], []>} : vector<8x32xbf16>, vector<32x128xbf16>, vector<8x128xf32> -> vector<8x128xf32>
    %100 = arith.addf %99, %15 : vector<8x128xf32>
    %c8_i32_38 = arith.constant 8 : i32
    %101 = arith.muli %c2_i32, %c8_i32_38 : i32
    %102 = tpu.assume_multiple %101, 8 : i32
    %103 = arith.index_cast %102 : i32 to index
    %c0_39 = arith.constant 0 : index
    %104 = vector.load %arg12[%103, %c0_39] : memref<64x128xf32, #tpu.memory_space<vmem>>, vector<8x128xf32>
    %105 = arith.truncf %80 : vector<8x32xf32> to vector<8x32xbf16>
    %c0_40 = arith.constant 0 : index
    %c0_41 = arith.constant 0 : index
    %106 = vector.load %arg3[%c0_40, %c0_41] : memref<32x128xbf16, #tpu.memory_space<vmem>>, vector<32x128xbf16>
    %cst_42 = arith.constant dense<0.000000e+00> : vector<8x128xf32>
    %107 = tpu.matmul %105, %106, %cst_42 {dimension_numbers = #tpu.dot_dimension_numbers<[1], [0], [0], [1], [0, 0, 1, 1], [], []>} : vector<8x32xbf16>, vector<32x128xbf16>, vector<8x128xf32> -> vector<8x128xf32>
    %108 = arith.addf %104, %107 : vector<8x128xf32>
    %109 = math.tanh %108 : vector<8x128xf32>
    %110 = arith.mulf %109, %9 : vector<8x128xf32>
    %111 = arith.addf %110, %12 : vector<8x128xf32>
    %112 = vector.extract_strided_slice %111 {offsets = [0, 0], sizes = [8, 32], strides = [1, 1]} : vector<8x128xf32> to vector<8x32xf32>
    %113 = vector.extract_strided_slice %111 {offsets = [0, 32], sizes = [8, 32], strides = [1, 1]} : vector<8x128xf32> to vector<8x32xf32>
    %114 = vector.extract_strided_slice %111 {offsets = [0, 64], sizes = [8, 32], strides = [1, 1]} : vector<8x128xf32> to vector<8x32xf32>
    %115 = vector.extract_strided_slice %111 {offsets = [0, 96], sizes = [8, 32], strides = [1, 1]} : vector<8x128xf32> to vector<8x32xf32>
    %116 = arith.mulf %113, %78 : vector<8x32xf32>
    %117 = arith.mulf %112, %114 : vector<8x32xf32>
    %118 = arith.addf %116, %117 : vector<8x32xf32>
    %119 = math.tanh %118 : vector<8x32xf32>
    %120 = arith.mulf %115, %119 : vector<8x32xf32>
    %121 = arith.truncf %120 : vector<8x32xf32> to vector<8x32xbf16>
    %c0_43 = arith.constant 0 : index
    %c0_44 = arith.constant 0 : index
    %122 = vector.load %arg4[%c0_43, %c0_44] : memref<32x128xbf16, #tpu.memory_space<vmem>>, vector<32x128xbf16>
    %cst_45 = arith.constant dense<0.000000e+00> : vector<8x128xf32>
    %123 = tpu.matmul %121, %122, %cst_45 {dimension_numbers = #tpu.dot_dimension_numbers<[1], [0], [0], [1], [0, 0, 1, 1], [], []>} : vector<8x32xbf16>, vector<32x128xbf16>, vector<8x128xf32> -> vector<8x128xf32>
    %124 = arith.addf %100, %123 : vector<8x128xf32>
    %125 = math.tanh %124 : vector<8x128xf32>
    %126 = arith.mulf %125, %9 : vector<8x128xf32>
    %127 = arith.addf %126, %12 : vector<8x128xf32>
    %128 = vector.extract_strided_slice %127 {offsets = [0, 0], sizes = [8, 32], strides = [1, 1]} : vector<8x128xf32> to vector<8x32xf32>
    %129 = vector.extract_strided_slice %127 {offsets = [0, 32], sizes = [8, 32], strides = [1, 1]} : vector<8x128xf32> to vector<8x32xf32>
    %130 = vector.extract_strided_slice %127 {offsets = [0, 64], sizes = [8, 32], strides = [1, 1]} : vector<8x128xf32> to vector<8x32xf32>
    %131 = vector.extract_strided_slice %127 {offsets = [0, 96], sizes = [8, 32], strides = [1, 1]} : vector<8x128xf32> to vector<8x32xf32>
    %132 = arith.mulf %129, %94 : vector<8x32xf32>
    %133 = arith.mulf %128, %130 : vector<8x32xf32>
    %134 = arith.addf %132, %133 : vector<8x32xf32>
    %135 = math.tanh %134 : vector<8x32xf32>
    %136 = arith.mulf %131, %135 : vector<8x32xf32>
    %c3_i32 = arith.constant 3 : i32
    %137 = arith.truncf %136 : vector<8x32xf32> to vector<8x32xbf16>
    %c0_46 = arith.constant 0 : index
    %c0_47 = arith.constant 0 : index
    %138 = vector.load %arg5[%c0_46, %c0_47] : memref<32x128xbf16, #tpu.memory_space<vmem>>, vector<32x128xbf16>
    %cst_48 = arith.constant dense<0.000000e+00> : vector<8x128xf32>
    %139 = tpu.matmul %137, %138, %cst_48 {dimension_numbers = #tpu.dot_dimension_numbers<[1], [0], [0], [1], [0, 0, 1, 1], [], []>} : vector<8x32xbf16>, vector<32x128xbf16>, vector<8x128xf32> -> vector<8x128xf32>
    %140 = arith.addf %139, %15 : vector<8x128xf32>
    %c8_i32_49 = arith.constant 8 : i32
    %141 = arith.muli %c3_i32, %c8_i32_49 : i32
    %142 = tpu.assume_multiple %141, 8 : i32
    %143 = arith.index_cast %142 : i32 to index
    %c0_50 = arith.constant 0 : index
    %144 = vector.load %arg12[%143, %c0_50] : memref<64x128xf32, #tpu.memory_space<vmem>>, vector<8x128xf32>
    %145 = arith.truncf %120 : vector<8x32xf32> to vector<8x32xbf16>
    %c0_51 = arith.constant 0 : index
    %c0_52 = arith.constant 0 : index
    %146 = vector.load %arg3[%c0_51, %c0_52] : memref<32x128xbf16, #tpu.memory_space<vmem>>, vector<32x128xbf16>
    %cst_53 = arith.constant dense<0.000000e+00> : vector<8x128xf32>
    %147 = tpu.matmul %145, %146, %cst_53 {dimension_numbers = #tpu.dot_dimension_numbers<[1], [0], [0], [1], [0, 0, 1, 1], [], []>} : vector<8x32xbf16>, vector<32x128xbf16>, vector<8x128xf32> -> vector<8x128xf32>
    %148 = arith.addf %144, %147 : vector<8x128xf32>
    %149 = math.tanh %148 : vector<8x128xf32>
    %150 = arith.mulf %149, %9 : vector<8x128xf32>
    %151 = arith.addf %150, %12 : vector<8x128xf32>
    %152 = vector.extract_strided_slice %151 {offsets = [0, 0], sizes = [8, 32], strides = [1, 1]} : vector<8x128xf32> to vector<8x32xf32>
    %153 = vector.extract_strided_slice %151 {offsets = [0, 32], sizes = [8, 32], strides = [1, 1]} : vector<8x128xf32> to vector<8x32xf32>
    %154 = vector.extract_strided_slice %151 {offsets = [0, 64], sizes = [8, 32], strides = [1, 1]} : vector<8x128xf32> to vector<8x32xf32>
    %155 = vector.extract_strided_slice %151 {offsets = [0, 96], sizes = [8, 32], strides = [1, 1]} : vector<8x128xf32> to vector<8x32xf32>
    %156 = arith.mulf %153, %118 : vector<8x32xf32>
    %157 = arith.mulf %152, %154 : vector<8x32xf32>
    %158 = arith.addf %156, %157 : vector<8x32xf32>
    %159 = math.tanh %158 : vector<8x32xf32>
    %160 = arith.mulf %155, %159 : vector<8x32xf32>
    %161 = arith.truncf %160 : vector<8x32xf32> to vector<8x32xbf16>
    %c0_54 = arith.constant 0 : index
    %c0_55 = arith.constant 0 : index
    %162 = vector.load %arg4[%c0_54, %c0_55] : memref<32x128xbf16, #tpu.memory_space<vmem>>, vector<32x128xbf16>
    %cst_56 = arith.constant dense<0.000000e+00> : vector<8x128xf32>
    %163 = tpu.matmul %161, %162, %cst_56 {dimension_numbers = #tpu.dot_dimension_numbers<[1], [0], [0], [1], [0, 0, 1, 1], [], []>} : vector<8x32xbf16>, vector<32x128xbf16>, vector<8x128xf32> -> vector<8x128xf32>
    %164 = arith.addf %140, %163 : vector<8x128xf32>
    %165 = math.tanh %164 : vector<8x128xf32>
    %166 = arith.mulf %165, %9 : vector<8x128xf32>
    %167 = arith.addf %166, %12 : vector<8x128xf32>
    %168 = vector.extract_strided_slice %167 {offsets = [0, 0], sizes = [8, 32], strides = [1, 1]} : vector<8x128xf32> to vector<8x32xf32>
    %169 = vector.extract_strided_slice %167 {offsets = [0, 32], sizes = [8, 32], strides = [1, 1]} : vector<8x128xf32> to vector<8x32xf32>
    %170 = vector.extract_strided_slice %167 {offsets = [0, 64], sizes = [8, 32], strides = [1, 1]} : vector<8x128xf32> to vector<8x32xf32>
    %171 = vector.extract_strided_slice %167 {offsets = [0, 96], sizes = [8, 32], strides = [1, 1]} : vector<8x128xf32> to vector<8x32xf32>
    %172 = arith.mulf %169, %134 : vector<8x32xf32>
    %173 = arith.mulf %168, %170 : vector<8x32xf32>
    %174 = arith.addf %172, %173 : vector<8x32xf32>
    %175 = math.tanh %174 : vector<8x32xf32>
    %176 = arith.mulf %171, %175 : vector<8x32xf32>
    %c4_i32 = arith.constant 4 : i32
    %177 = arith.truncf %176 : vector<8x32xf32> to vector<8x32xbf16>
    %c0_57 = arith.constant 0 : index
    %c0_58 = arith.constant 0 : index
    %178 = vector.load %arg5[%c0_57, %c0_58] : memref<32x128xbf16, #tpu.memory_space<vmem>>, vector<32x128xbf16>
    %cst_59 = arith.constant dense<0.000000e+00> : vector<8x128xf32>
    %179 = tpu.matmul %177, %178, %cst_59 {dimension_numbers = #tpu.dot_dimension_numbers<[1], [0], [0], [1], [0, 0, 1, 1], [], []>} : vector<8x32xbf16>, vector<32x128xbf16>, vector<8x128xf32> -> vector<8x128xf32>
    %180 = arith.addf %179, %15 : vector<8x128xf32>
    %c8_i32_60 = arith.constant 8 : i32
    %181 = arith.muli %c4_i32, %c8_i32_60 : i32
    %182 = tpu.assume_multiple %181, 8 : i32
    %183 = arith.index_cast %182 : i32 to index
    %c0_61 = arith.constant 0 : index
    %184 = vector.load %arg12[%183, %c0_61] : memref<64x128xf32, #tpu.memory_space<vmem>>, vector<8x128xf32>
    %185 = arith.truncf %160 : vector<8x32xf32> to vector<8x32xbf16>
    %c0_62 = arith.constant 0 : index
    %c0_63 = arith.constant 0 : index
    %186 = vector.load %arg3[%c0_62, %c0_63] : memref<32x128xbf16, #tpu.memory_space<vmem>>, vector<32x128xbf16>
    %cst_64 = arith.constant dense<0.000000e+00> : vector<8x128xf32>
    %187 = tpu.matmul %185, %186, %cst_64 {dimension_numbers = #tpu.dot_dimension_numbers<[1], [0], [0], [1], [0, 0, 1, 1], [], []>} : vector<8x32xbf16>, vector<32x128xbf16>, vector<8x128xf32> -> vector<8x128xf32>
    %188 = arith.addf %184, %187 : vector<8x128xf32>
    %189 = math.tanh %188 : vector<8x128xf32>
    %190 = arith.mulf %189, %9 : vector<8x128xf32>
    %191 = arith.addf %190, %12 : vector<8x128xf32>
    %192 = vector.extract_strided_slice %191 {offsets = [0, 0], sizes = [8, 32], strides = [1, 1]} : vector<8x128xf32> to vector<8x32xf32>
    %193 = vector.extract_strided_slice %191 {offsets = [0, 32], sizes = [8, 32], strides = [1, 1]} : vector<8x128xf32> to vector<8x32xf32>
    %194 = vector.extract_strided_slice %191 {offsets = [0, 64], sizes = [8, 32], strides = [1, 1]} : vector<8x128xf32> to vector<8x32xf32>
    %195 = vector.extract_strided_slice %191 {offsets = [0, 96], sizes = [8, 32], strides = [1, 1]} : vector<8x128xf32> to vector<8x32xf32>
    %196 = arith.mulf %193, %158 : vector<8x32xf32>
    %197 = arith.mulf %192, %194 : vector<8x32xf32>
    %198 = arith.addf %196, %197 : vector<8x32xf32>
    %199 = math.tanh %198 : vector<8x32xf32>
    %200 = arith.mulf %195, %199 : vector<8x32xf32>
    %201 = arith.truncf %200 : vector<8x32xf32> to vector<8x32xbf16>
    %c0_65 = arith.constant 0 : index
    %c0_66 = arith.constant 0 : index
    %202 = vector.load %arg4[%c0_65, %c0_66] : memref<32x128xbf16, #tpu.memory_space<vmem>>, vector<32x128xbf16>
    %cst_67 = arith.constant dense<0.000000e+00> : vector<8x128xf32>
    %203 = tpu.matmul %201, %202, %cst_67 {dimension_numbers = #tpu.dot_dimension_numbers<[1], [0], [0], [1], [0, 0, 1, 1], [], []>} : vector<8x32xbf16>, vector<32x128xbf16>, vector<8x128xf32> -> vector<8x128xf32>
    %204 = arith.addf %180, %203 : vector<8x128xf32>
    %205 = math.tanh %204 : vector<8x128xf32>
    %206 = arith.mulf %205, %9 : vector<8x128xf32>
    %207 = arith.addf %206, %12 : vector<8x128xf32>
    %208 = vector.extract_strided_slice %207 {offsets = [0, 0], sizes = [8, 32], strides = [1, 1]} : vector<8x128xf32> to vector<8x32xf32>
    %209 = vector.extract_strided_slice %207 {offsets = [0, 32], sizes = [8, 32], strides = [1, 1]} : vector<8x128xf32> to vector<8x32xf32>
    %210 = vector.extract_strided_slice %207 {offsets = [0, 64], sizes = [8, 32], strides = [1, 1]} : vector<8x128xf32> to vector<8x32xf32>
    %211 = vector.extract_strided_slice %207 {offsets = [0, 96], sizes = [8, 32], strides = [1, 1]} : vector<8x128xf32> to vector<8x32xf32>
    %212 = arith.mulf %209, %174 : vector<8x32xf32>
    %213 = arith.mulf %208, %210 : vector<8x32xf32>
    %214 = arith.addf %212, %213 : vector<8x32xf32>
    %215 = math.tanh %214 : vector<8x32xf32>
    %216 = arith.mulf %211, %215 : vector<8x32xf32>
    %c5_i32 = arith.constant 5 : i32
    %217 = arith.truncf %216 : vector<8x32xf32> to vector<8x32xbf16>
    %c0_68 = arith.constant 0 : index
    %c0_69 = arith.constant 0 : index
    %218 = vector.load %arg5[%c0_68, %c0_69] : memref<32x128xbf16, #tpu.memory_space<vmem>>, vector<32x128xbf16>
    %cst_70 = arith.constant dense<0.000000e+00> : vector<8x128xf32>
    %219 = tpu.matmul %217, %218, %cst_70 {dimension_numbers = #tpu.dot_dimension_numbers<[1], [0], [0], [1], [0, 0, 1, 1], [], []>} : vector<8x32xbf16>, vector<32x128xbf16>, vector<8x128xf32> -> vector<8x128xf32>
    %220 = arith.addf %219, %15 : vector<8x128xf32>
    %c8_i32_71 = arith.constant 8 : i32
    %221 = arith.muli %c5_i32, %c8_i32_71 : i32
    %222 = tpu.assume_multiple %221, 8 : i32
    %223 = arith.index_cast %222 : i32 to index
    %c0_72 = arith.constant 0 : index
    %224 = vector.load %arg12[%223, %c0_72] : memref<64x128xf32, #tpu.memory_space<vmem>>, vector<8x128xf32>
    %225 = arith.truncf %200 : vector<8x32xf32> to vector<8x32xbf16>
    %c0_73 = arith.constant 0 : index
    %c0_74 = arith.constant 0 : index
    %226 = vector.load %arg3[%c0_73, %c0_74] : memref<32x128xbf16, #tpu.memory_space<vmem>>, vector<32x128xbf16>
    %cst_75 = arith.constant dense<0.000000e+00> : vector<8x128xf32>
    %227 = tpu.matmul %225, %226, %cst_75 {dimension_numbers = #tpu.dot_dimension_numbers<[1], [0], [0], [1], [0, 0, 1, 1], [], []>} : vector<8x32xbf16>, vector<32x128xbf16>, vector<8x128xf32> -> vector<8x128xf32>
    %228 = arith.addf %224, %227 : vector<8x128xf32>
    %229 = math.tanh %228 : vector<8x128xf32>
    %230 = arith.mulf %229, %9 : vector<8x128xf32>
    %231 = arith.addf %230, %12 : vector<8x128xf32>
    %232 = vector.extract_strided_slice %231 {offsets = [0, 0], sizes = [8, 32], strides = [1, 1]} : vector<8x128xf32> to vector<8x32xf32>
    %233 = vector.extract_strided_slice %231 {offsets = [0, 32], sizes = [8, 32], strides = [1, 1]} : vector<8x128xf32> to vector<8x32xf32>
    %234 = vector.extract_strided_slice %231 {offsets = [0, 64], sizes = [8, 32], strides = [1, 1]} : vector<8x128xf32> to vector<8x32xf32>
    %235 = vector.extract_strided_slice %231 {offsets = [0, 96], sizes = [8, 32], strides = [1, 1]} : vector<8x128xf32> to vector<8x32xf32>
    %236 = arith.mulf %233, %198 : vector<8x32xf32>
    %237 = arith.mulf %232, %234 : vector<8x32xf32>
    %238 = arith.addf %236, %237 : vector<8x32xf32>
    %239 = math.tanh %238 : vector<8x32xf32>
    %240 = arith.mulf %235, %239 : vector<8x32xf32>
    %241 = arith.truncf %240 : vector<8x32xf32> to vector<8x32xbf16>
    %c0_76 = arith.constant 0 : index
    %c0_77 = arith.constant 0 : index
    %242 = vector.load %arg4[%c0_76, %c0_77] : memref<32x128xbf16, #tpu.memory_space<vmem>>, vector<32x128xbf16>
    %cst_78 = arith.constant dense<0.000000e+00> : vector<8x128xf32>
    %243 = tpu.matmul %241, %242, %cst_78 {dimension_numbers = #tpu.dot_dimension_numbers<[1], [0], [0], [1], [0, 0, 1, 1], [], []>} : vector<8x32xbf16>, vector<32x128xbf16>, vector<8x128xf32> -> vector<8x128xf32>
    %244 = arith.addf %220, %243 : vector<8x128xf32>
    %245 = math.tanh %244 : vector<8x128xf32>
    %246 = arith.mulf %245, %9 : vector<8x128xf32>
    %247 = arith.addf %246, %12 : vector<8x128xf32>
    %248 = vector.extract_strided_slice %247 {offsets = [0, 0], sizes = [8, 32], strides = [1, 1]} : vector<8x128xf32> to vector<8x32xf32>
    %249 = vector.extract_strided_slice %247 {offsets = [0, 32], sizes = [8, 32], strides = [1, 1]} : vector<8x128xf32> to vector<8x32xf32>
    %250 = vector.extract_strided_slice %247 {offsets = [0, 64], sizes = [8, 32], strides = [1, 1]} : vector<8x128xf32> to vector<8x32xf32>
    %251 = vector.extract_strided_slice %247 {offsets = [0, 96], sizes = [8, 32], strides = [1, 1]} : vector<8x128xf32> to vector<8x32xf32>
    %252 = arith.mulf %249, %214 : vector<8x32xf32>
    %253 = arith.mulf %248, %250 : vector<8x32xf32>
    %254 = arith.addf %252, %253 : vector<8x32xf32>
    %255 = math.tanh %254 : vector<8x32xf32>
    %256 = arith.mulf %251, %255 : vector<8x32xf32>
    %c6_i32 = arith.constant 6 : i32
    %257 = arith.truncf %256 : vector<8x32xf32> to vector<8x32xbf16>
    %c0_79 = arith.constant 0 : index
    %c0_80 = arith.constant 0 : index
    %258 = vector.load %arg5[%c0_79, %c0_80] : memref<32x128xbf16, #tpu.memory_space<vmem>>, vector<32x128xbf16>
    %cst_81 = arith.constant dense<0.000000e+00> : vector<8x128xf32>
    %259 = tpu.matmul %257, %258, %cst_81 {dimension_numbers = #tpu.dot_dimension_numbers<[1], [0], [0], [1], [0, 0, 1, 1], [], []>} : vector<8x32xbf16>, vector<32x128xbf16>, vector<8x128xf32> -> vector<8x128xf32>
    %260 = arith.addf %259, %15 : vector<8x128xf32>
    %c8_i32_82 = arith.constant 8 : i32
    %261 = arith.muli %c6_i32, %c8_i32_82 : i32
    %262 = tpu.assume_multiple %261, 8 : i32
    %263 = arith.index_cast %262 : i32 to index
    %c0_83 = arith.constant 0 : index
    %264 = vector.load %arg12[%263, %c0_83] : memref<64x128xf32, #tpu.memory_space<vmem>>, vector<8x128xf32>
    %265 = arith.truncf %240 : vector<8x32xf32> to vector<8x32xbf16>
    %c0_84 = arith.constant 0 : index
    %c0_85 = arith.constant 0 : index
    %266 = vector.load %arg3[%c0_84, %c0_85] : memref<32x128xbf16, #tpu.memory_space<vmem>>, vector<32x128xbf16>
    %cst_86 = arith.constant dense<0.000000e+00> : vector<8x128xf32>
    %267 = tpu.matmul %265, %266, %cst_86 {dimension_numbers = #tpu.dot_dimension_numbers<[1], [0], [0], [1], [0, 0, 1, 1], [], []>} : vector<8x32xbf16>, vector<32x128xbf16>, vector<8x128xf32> -> vector<8x128xf32>
    %268 = arith.addf %264, %267 : vector<8x128xf32>
    %269 = math.tanh %268 : vector<8x128xf32>
    %270 = arith.mulf %269, %9 : vector<8x128xf32>
    %271 = arith.addf %270, %12 : vector<8x128xf32>
    %272 = vector.extract_strided_slice %271 {offsets = [0, 0], sizes = [8, 32], strides = [1, 1]} : vector<8x128xf32> to vector<8x32xf32>
    %273 = vector.extract_strided_slice %271 {offsets = [0, 32], sizes = [8, 32], strides = [1, 1]} : vector<8x128xf32> to vector<8x32xf32>
    %274 = vector.extract_strided_slice %271 {offsets = [0, 64], sizes = [8, 32], strides = [1, 1]} : vector<8x128xf32> to vector<8x32xf32>
    %275 = vector.extract_strided_slice %271 {offsets = [0, 96], sizes = [8, 32], strides = [1, 1]} : vector<8x128xf32> to vector<8x32xf32>
    %276 = arith.mulf %273, %238 : vector<8x32xf32>
    %277 = arith.mulf %272, %274 : vector<8x32xf32>
    %278 = arith.addf %276, %277 : vector<8x32xf32>
    %279 = math.tanh %278 : vector<8x32xf32>
    %280 = arith.mulf %275, %279 : vector<8x32xf32>
    %281 = arith.truncf %280 : vector<8x32xf32> to vector<8x32xbf16>
    %c0_87 = arith.constant 0 : index
    %c0_88 = arith.constant 0 : index
    %282 = vector.load %arg4[%c0_87, %c0_88] : memref<32x128xbf16, #tpu.memory_space<vmem>>, vector<32x128xbf16>
    %cst_89 = arith.constant dense<0.000000e+00> : vector<8x128xf32>
    %283 = tpu.matmul %281, %282, %cst_89 {dimension_numbers = #tpu.dot_dimension_numbers<[1], [0], [0], [1], [0, 0, 1, 1], [], []>} : vector<8x32xbf16>, vector<32x128xbf16>, vector<8x128xf32> -> vector<8x128xf32>
    %284 = arith.addf %260, %283 : vector<8x128xf32>
    %285 = math.tanh %284 : vector<8x128xf32>
    %286 = arith.mulf %285, %9 : vector<8x128xf32>
    %287 = arith.addf %286, %12 : vector<8x128xf32>
    %288 = vector.extract_strided_slice %287 {offsets = [0, 0], sizes = [8, 32], strides = [1, 1]} : vector<8x128xf32> to vector<8x32xf32>
    %289 = vector.extract_strided_slice %287 {offsets = [0, 32], sizes = [8, 32], strides = [1, 1]} : vector<8x128xf32> to vector<8x32xf32>
    %290 = vector.extract_strided_slice %287 {offsets = [0, 64], sizes = [8, 32], strides = [1, 1]} : vector<8x128xf32> to vector<8x32xf32>
    %291 = vector.extract_strided_slice %287 {offsets = [0, 96], sizes = [8, 32], strides = [1, 1]} : vector<8x128xf32> to vector<8x32xf32>
    %292 = arith.mulf %289, %254 : vector<8x32xf32>
    %293 = arith.mulf %288, %290 : vector<8x32xf32>
    %294 = arith.addf %292, %293 : vector<8x32xf32>
    %295 = math.tanh %294 : vector<8x32xf32>
    %296 = arith.mulf %291, %295 : vector<8x32xf32>
    %c7_i32 = arith.constant 7 : i32
    %297 = arith.truncf %296 : vector<8x32xf32> to vector<8x32xbf16>
    %c0_90 = arith.constant 0 : index
    %c0_91 = arith.constant 0 : index
    %298 = vector.load %arg5[%c0_90, %c0_91] : memref<32x128xbf16, #tpu.memory_space<vmem>>, vector<32x128xbf16>
    %cst_92 = arith.constant dense<0.000000e+00> : vector<8x128xf32>
    %299 = tpu.matmul %297, %298, %cst_92 {dimension_numbers = #tpu.dot_dimension_numbers<[1], [0], [0], [1], [0, 0, 1, 1], [], []>} : vector<8x32xbf16>, vector<32x128xbf16>, vector<8x128xf32> -> vector<8x128xf32>
    %300 = arith.addf %299, %15 : vector<8x128xf32>
    %c8_i32_93 = arith.constant 8 : i32
    %301 = arith.muli %c7_i32, %c8_i32_93 : i32
    %302 = tpu.assume_multiple %301, 8 : i32
    %303 = arith.index_cast %302 : i32 to index
    %c0_94 = arith.constant 0 : index
    %304 = vector.load %arg12[%303, %c0_94] : memref<64x128xf32, #tpu.memory_space<vmem>>, vector<8x128xf32>
    %305 = arith.truncf %280 : vector<8x32xf32> to vector<8x32xbf16>
    %c0_95 = arith.constant 0 : index
    %c0_96 = arith.constant 0 : index
    %306 = vector.load %arg3[%c0_95, %c0_96] : memref<32x128xbf16, #tpu.memory_space<vmem>>, vector<32x128xbf16>
    %cst_97 = arith.constant dense<0.000000e+00> : vector<8x128xf32>
    %307 = tpu.matmul %305, %306, %cst_97 {dimension_numbers = #tpu.dot_dimension_numbers<[1], [0], [0], [1], [0, 0, 1, 1], [], []>} : vector<8x32xbf16>, vector<32x128xbf16>, vector<8x128xf32> -> vector<8x128xf32>
    %308 = arith.addf %304, %307 : vector<8x128xf32>
    %309 = math.tanh %308 : vector<8x128xf32>
    %310 = arith.mulf %309, %9 : vector<8x128xf32>
    %311 = arith.addf %310, %12 : vector<8x128xf32>
    %312 = vector.extract_strided_slice %311 {offsets = [0, 0], sizes = [8, 32], strides = [1, 1]} : vector<8x128xf32> to vector<8x32xf32>
    %313 = vector.extract_strided_slice %311 {offsets = [0, 32], sizes = [8, 32], strides = [1, 1]} : vector<8x128xf32> to vector<8x32xf32>
    %314 = vector.extract_strided_slice %311 {offsets = [0, 64], sizes = [8, 32], strides = [1, 1]} : vector<8x128xf32> to vector<8x32xf32>
    %315 = vector.extract_strided_slice %311 {offsets = [0, 96], sizes = [8, 32], strides = [1, 1]} : vector<8x128xf32> to vector<8x32xf32>
    %316 = arith.mulf %313, %278 : vector<8x32xf32>
    %317 = arith.mulf %312, %314 : vector<8x32xf32>
    %318 = arith.addf %316, %317 : vector<8x32xf32>
    %319 = math.tanh %318 : vector<8x32xf32>
    %320 = arith.mulf %315, %319 : vector<8x32xf32>
    %321 = arith.truncf %320 : vector<8x32xf32> to vector<8x32xbf16>
    %c0_98 = arith.constant 0 : index
    %c0_99 = arith.constant 0 : index
    %322 = vector.load %arg4[%c0_98, %c0_99] : memref<32x128xbf16, #tpu.memory_space<vmem>>, vector<32x128xbf16>
    %cst_100 = arith.constant dense<0.000000e+00> : vector<8x128xf32>
    %323 = tpu.matmul %321, %322, %cst_100 {dimension_numbers = #tpu.dot_dimension_numbers<[1], [0], [0], [1], [0, 0, 1, 1], [], []>} : vector<8x32xbf16>, vector<32x128xbf16>, vector<8x128xf32> -> vector<8x128xf32>
    %324 = arith.addf %300, %323 : vector<8x128xf32>
    %325 = math.tanh %324 : vector<8x128xf32>
    %326 = arith.mulf %325, %9 : vector<8x128xf32>
    %327 = arith.addf %326, %12 : vector<8x128xf32>
    %328 = vector.extract_strided_slice %327 {offsets = [0, 0], sizes = [8, 32], strides = [1, 1]} : vector<8x128xf32> to vector<8x32xf32>
    %329 = vector.extract_strided_slice %327 {offsets = [0, 32], sizes = [8, 32], strides = [1, 1]} : vector<8x128xf32> to vector<8x32xf32>
    %330 = vector.extract_strided_slice %327 {offsets = [0, 64], sizes = [8, 32], strides = [1, 1]} : vector<8x128xf32> to vector<8x32xf32>
    %331 = vector.extract_strided_slice %327 {offsets = [0, 96], sizes = [8, 32], strides = [1, 1]} : vector<8x128xf32> to vector<8x32xf32>
    %332 = arith.mulf %329, %294 : vector<8x32xf32>
    %333 = arith.mulf %328, %330 : vector<8x32xf32>
    %334 = arith.addf %332, %333 : vector<8x32xf32>
    %335 = math.tanh %334 : vector<8x32xf32>
    %336 = arith.mulf %331, %335 : vector<8x32xf32>
    %c8_i32_101 = arith.constant 8 : i32
    %337 = arith.truncf %336 : vector<8x32xf32> to vector<8x32xbf16>
    %c0_102 = arith.constant 0 : index
    %c0_103 = arith.constant 0 : index
    %338 = vector.load %arg9[%c0_102, %c0_103] : memref<32x128xbf16, #tpu.memory_space<vmem>>, vector<32x128xbf16>
    %cst_104 = arith.constant dense<0.000000e+00> : vector<8x128xf32>
    %339 = tpu.matmul %337, %338, %cst_104 {dimension_numbers = #tpu.dot_dimension_numbers<[1], [0], [0], [1], [0, 0, 1, 1], [], []>} : vector<8x32xbf16>, vector<32x128xbf16>, vector<8x128xf32> -> vector<8x128xf32>
    %c0_105 = arith.constant 0 : index
    %c0_106 = arith.constant 0 : index
    %340 = vector.load %arg10[%c0_105, %c0_106] : memref<1x128xf32, #tpu.memory_space<vmem>>, vector<1x128xf32>
    %341 = vector.broadcast %340 : vector<1x128xf32> to vector<8x128xf32>
    %342 = arith.addf %339, %341 : vector<8x128xf32>
    %c0_107 = arith.constant 0 : index
    %c0_108 = arith.constant 0 : index
    %343 = vector.load %arg11[%c0_107, %c0_108] : memref<8x128xf32, #tpu.memory_space<vmem>>, vector<8x128xf32>
    tpu.vector_store %arg11[%c0_107, %c0_108], %342 {strides = array<i32>} : memref<8x128xf32, #tpu.memory_space<vmem>>, vector<8x128xf32>,
    return
  }
}

</mosaic_0001>

<bundles_post_ra>
// kernel: tpu_custom_call.1
= control target key start
LH: loop header
LB: loop body
LE: loop exit
PB: predicated region body
PF: predicated region fallthrough
CT: control target
= control target key end

     0   :  { %16 = vsyncpa [#allocation4], 0  ;;  %s2865_s0 = inlined_call_operand.vmem [shape: bf16[64,8], index: 0, kind: input, shape index: {}]   ;;  %s2866_s1 = inlined_call_operand.hbm [shape: bf16[8,128], index: 1, kind: input, shape index: {}]   ;;  %s2867_s2 = inlined_call_operand.vmem [shape: f32[1,128], index: 2, kind: input, shape index: {}]   ;;  %s2868_s3 = inlined_call_operand.vmem [shape: bf16[32,128], index: 3, kind: input, shape index: {}]   ;;  %s2869_s4 = inlined_call_operand.vmem [shape: bf16[32,128], index: 4, kind: input, shape index: {}]   ;;  %s2870_s5 = inlined_call_operand.vmem [shape: bf16[32,128], index: 5, kind: input, shape index: {}]   ;;  %s2871_s6 = inlined_call_operand.vmem [shape: f32[1,128], index: 6, kind: input, shape index: {}]   ;;  %s2872_s7 = inlined_call_operand.hbm [shape: f32[1,128], index: 7, kind: input, shape index: {}]   ;;  %s2873_s8 = inlined_call_operand.hbm [shape: f32[1,128], index: 8, kind: input, shape index: {}]   ;;  %s2874_s9 = inlined_call_operand.vmem [shape: bf16[32,128], index: 9, kind: input, shape index: {}]   ;;  %s2875_s10 = inlined_call_operand.vmem [shape: f32[1,128], index: 10, kind: input, shape index: {}]   ;;  %s2876_s11 = inlined_call_operand.hbm [shape: f32[8,128], index: 11, kind: output, shape index: {}]  }
   0x1   :  { %17 = vsyncpa [#allocation7], 0 }
   0x2   :  { %18 = vsyncpa [#allocation5], 0  ;;  %s2331_s17 = smov [#allocation6]   ;;  %s2332_s19 = smov [#allocation3]  }
   0x3   :  { %s47_s18 = sshll.u32 %s2331_s17, 4  ;;  %s27_s20 = sshll.u32 %s2332_s19, 4  ;;  %s48_s18 = int_to_ptr.vmem [resolvable:$true] %s47_s18  ;;  %s28_s20 = int_to_ptr.vmem [resolvable:$true] %s27_s20 }
   0x4   :  { %s2237_s23 = scalar_lea.hbm %s2872_s7, 16 }
   0x5   :  { %p2238_p0 = scmp.ne.s32.totalorder %s2872_s7, %s2237_s23  ;;  %p2241_p1 = scmp.lt.u32.totalorder %s2237_s23, %s2872_s7 }
   0x7   :  { %p2243_p2 = pnand %p2241_p1, %p2238_p0 }
   0x9   :  { %2246 = shalt.err (!%p2243_p2)
}
   0xa   :  { %s2247_s28 = scalar_lea.vmem %s48_s18, 16  ;;  %s2251_s29 = scalar_lea.vmem %s48_s18, 32 }
   0xb   :  { %p2248_p3 = scmp.ne.s32.totalorder %s48_s18, %s2247_s28  ;;  %p2252_p4 = scmp.lt.s32.totalorder %s48_s18, %s48_s18 }
   0xc   :  { %p2253_p5 = scmp.lt.s32.totalorder %s2251_s29, %s2247_s28 }
   0xe   :  { %p2254_p6 = por %p2253_p5, %p2252_p4 }
  0x10   :  { %p2255_p7 = pnand %p2254_p6, %p2248_p3 }
  0x12   :  { %2258 = shalt.err (!%p2255_p7)
}
  0x13   :  { %50 = dma.hbm_to_vmem [thread:$0]  %s2872_s7, 16, %s48_s18, [#allocation7]  }
  0x14   :  { %s2259_s15 = scalar_lea.hbm %s2866_s1, 64 }
  0x15   :  { %p2260_p8 = scmp.ne.s32.totalorder %s2866_s1, %s2259_s15  ;;  %p2263_p9 = scmp.lt.u32.totalorder %s2259_s15, %s2866_s1 }
  0x17   :  { %p2265_p10 = pnand %p2263_p9, %p2260_p8 }
  0x19   :  { %2268 = shalt.err (!%p2265_p10)
}
  0x1a   :  { %s2269_s22 = scalar_lea.vmem %s28_s20, 64  ;;  %p2274_p12 = scmp.lt.s32.totalorder %s28_s20, %s28_s20 }
  0x1b   :  { %p2270_p11 = scmp.ne.s32.totalorder %s28_s20, %s2269_s22  ;;  %p2275_p13 = scmp.lt.s32.totalorder %s2269_s22, %s2269_s22 }
  0x1d   :  { %p2276_p0 = por %p2275_p13, %p2274_p12 }
  0x1f   :  { %p2277_p1 = pnand %p2276_p0, %p2270_p11 }
  0x21   :  { %2280 = shalt.err (!%p2277_p1)
}
  0x22   :  { %30 = dma.hbm_to_vmem [thread:$0]  %s2866_s1, 64, %s28_s20, [#allocation4]  }
  0x23   :  { %s2333_s23 = smov [#allocation8]   ;;  %s2281_s27 = scalar_lea.hbm %s2873_s8, 16 }
  0x24   :  { %s57_s24 = sshll.u32 %s2333_s23, 4  ;;  %p2282_p2 = scmp.ne.s32.totalorder %s2873_s8, %s2281_s27  ;;  %s58_s24 = int_to_ptr.vmem [resolvable:$true] %s57_s24 }
  0x25   :  { %p2285_p3 = scmp.lt.u32.totalorder %s2281_s27, %s2873_s8 }
  0x27   :  { %p2287_p4 = pnand %p2285_p3, %p2282_p2 }
  0x29   :  { %2290 = shalt.err (!%p2287_p4)
}
  0x2a   :  { %s2291_s13 = scalar_lea.vmem %s58_s24, 16  ;;  %s2295_s1 = scalar_lea.vmem %s58_s24, 32 }
  0x2b   :  { %p2292_p5 = scmp.ne.s32.totalorder %s58_s24, %s2291_s13  ;;  %p2296_p6 = scmp.lt.s32.totalorder %s58_s24, %s58_s24 }
  0x2c   :  { %p2297_p7 = scmp.lt.s32.totalorder %s2295_s1, %s2291_s13 }
  0x2e   :  { %p2298_p8 = por %p2297_p7, %p2296_p6 }
  0x30   :  { %p2299_p9 = pnand %p2298_p8, %p2292_p5 }
  0x32   :  { %2302 = shalt.err (!%p2299_p9)
}
  0x33   :  { %60 = dma.hbm_to_vmem [thread:$0]  %s2873_s8, 16, %s58_s24, [#allocation7]  }
  0x34   :  { %2325 = dma.done.wait [#allocation4], 64  }
  0x35   :  { %2326 = vsyncadd [#allocation4], 4294967232 }
  0x36   :  { %2327 = dma.done.wait [#allocation7], 32  }
  0x37   :  { %2328 = vsyncadd [#allocation7], 4294967264  ;;  %v2334_v0 = vmov 0.0   ;;  %vm2335_vm0 = vmmov 0   ;;  %v2442_v1 = vld [vmem:[%s2870_s5] sm:$0xff]   ;;  %vm124_vm1 = vcmask 1043456  }
  0x38   :  { %1911 = vmatprep.subr.bf16.mxu1 %v2334_v0  ;;  %1915 = vmatprep.mubr.msk.bf16.mxu1 %vm2335_vm0, %v2334_v0  ;;  %v2447_v2 = vld [vmem:[%s2870_s5 + $0x8] sm:$0xff]   ;;  %v83_v3 = vld [vmem:[#allocation3] sm:$0xf]  ;;  %vm111_vm2 = vcmask 64512   ;;  %v2336_v8 = vmov 0   ;;  %s2337_s26 = smov 64  }
  0x39   :  { %1912 = vmatpush3.bf16.msra.mxu1 %v2442_v1  ;;  %2151 = vmatprep.subr.msk.bf16.mxu0 %vm124_vm1, %v83_v3  ;;  %v126_v4 = vsel %vm124_vm1, %v83_v3, 0  ;;  %v2164_v5 = vld [vmem:[%s2865_s0] sm:$0xff]   ;;  %v2165_v6 = vld [vmem:[%s2865_s0 + $0x8] sm:$0xff]   ;;  %vm238_vm3 = vcmask 261120   ;;  %v2169_v52 = vld [vmem:[%s2865_s0 + $0x10] sm:$0xff]   ;;  %s2339_s8 = smov [#allocation9]  }
  0x3a   :  { %1913 = vmatprep.subr.bf16.mxu1 %v2334_v0  ;;  %1902 = vmatpush3.bf16.msra.mxu0 %v126_v4  ;;  %v2462_v7 = vld [vmem:[%s2868_s3] sm:$0xff]   ;;  %v2473_v9 = vld [vmem:[%s2868_s3 + $0x8] sm:$0xff]   ;;  %v2170_v53 = vld [vmem:[%s2865_s0 + $0x18] sm:$0xff]  }
  0x3b   :  { %1935 = vmatprep.subr.bf16.mxu0 %v2334_v0  ;;  %1903 = vmatprep.mubr.msk.bf16.mxu0 %vm111_vm2, %v2164_v5  ;;  %v2493_v14 = vld [vmem:[%s2867_s2] ss:$0 sm:$0xff]  ;;  %v2496_v21 = vld [vmem:[#allocation6] ss:$0 sm:$0xff]  ;;  %v2498_v23 = vld [vmem:[#allocation8] ss:$0 sm:$0xff] }
  0x3c   :  { %s2338_s2 = smov 32   ;;  %v2510_v31 = vld [vmem:[%s2869_s4] sm:$0xff]   ;;  %v2516_v32 = vld [vmem:[%s2869_s4 + $0x8] sm:$0xff]  }
  0x3d   :  { %1914 = vmatpush3.bf16.msra.mxu1 %v2447_v2  ;;  %1904 = vmatmul.mubr.msk.bf16.vlgmr.msra.gmra.mrb[0].mxu0 %vm111_vm2, %v2165_v6  ;;  %v2533_v38 = vld [vmem:[%s2871_s6] ss:$0 sm:$0xff] }
  0x3e   :  { %1919 = vmatprep.subr.bf16.mxu1 %v2334_v0  ;;  %1936 = vmatpush3.bf16.msra.mxu0 %v2442_v1 }
  0x3f   :  { %1937 = vmatprep.subr.bf16.mxu0 %v2334_v0  ;;  %1907 = vmatprep.mubr.msk.bf16.mxu0 %vm111_vm2, %v2169_v52 }
  0x40   :  { %1916 = vmatmul.mubr.bf16.vlgmr.msra.gmra.mrb[0].mxu1 %v2336_v8 }
  0x41   :  { %1920 = vmatpush3.bf16.msra.mxu1 %v2462_v7  ;;  %1923 = vmatprep.mubr.msk.bf16.mxu1 %vm2335_vm0, %v2334_v0 }
  0x42   :  { %1921 = vmatprep.subr.bf16.mxu1 %v2334_v0  ;;  %1938 = vmatpush3.bf16.msra.mxu0 %v2447_v2 }
  0x43   :  { %1943 = vmatprep.subr.bf16.mxu0 %v2334_v0 }
  0x45   :  { %1922 = vmatpush3.bf16.msra.mxu1 %v2473_v9  ;;  %1908 = vmatmul.mubr.msk.bf16.gmra.mrb[4].mxu0 %vm111_vm2, %v2170_v53 }
  0x46   :  { %1927 = vmatprep.subr.bf16.mxu1 %v2334_v0  ;;  %1939 = vmatprep.mubr.msk.bf16.mxu0 %vm2335_vm0, %v2334_v0 }
  0x48   :  { %1924 = vmatmul.mubr.bf16.vlgmr.msra.gmra.mrb[4].mxu1 %v2336_v8 }
  0x49   :  { %1931 = vmatprep.mubr.msk.bf16.mxu1 %vm2335_vm0, %v2334_v0  ;;  %1928 = vmatpush3.bf16.msra.mxu1 %v2510_v31 }
  0x4a   :  { %1929 = vmatprep.subr.bf16.mxu1 %v2334_v0 }
  0x4d   :  { %1930 = vmatpush3.bf16.msra.mxu1 %v2516_v32 }
  0x4e   :  { %1959 = vmatprep.subr.bf16.mxu1 %v2334_v0 }
 0x110   :  { %v2484_v10 = vpop.f32.mrb[0].mxu0 }
 0x111   :  { %v162_v11 = vpop.f32.mrb[1].mxu0 }
 0x112   :  { %v2486_v12 = vpop.f32.mrb[2].mxu0  ;;  %v163_v15 = vadd.f32 %v2493_v14, %v162_v11 }
 0x113   :  { %v2488_v13 = vpop.f32.mrb[3].mxu0 }
 0x114   :  { %v166_v63 = vadd.f32 %v2493_v14, %v2488_v13 }
 0x118   :  { %v2555_v58 = vpop.f32.mrb[4].mxu0 }
 0x119   :  { %v2557_v59 = vpop.f32.mrb[5].mxu0 }
 0x11a   :  { %v2559_v60 = vpop.f32.mrb[6].mxu0 }
 0x11b   :  { %v333_v16 = vpop.f32.mrb[4].mxu1  ;;  %v2561_v61 = vpop.f32.mrb[7].mxu0 }
 0x11c   :  { %v339_v17 = vadd.f32 %v333_v16, %v163_v15  ;;  %v1925_v18 = vpop.f32.mrb[5].mxu1 }
 0x11d   :  { %v336_v19 = vpop.f32.mrb[6].mxu1 }
 0x11e   :  { %2173 = vtanh.f32 %v339_v17  ;;  %v1926_v20 = vpop.f32.mrb[7].mxu1 }
 0x128   :  { %v2174_v22 = vpop.eup %2173 }
 0x129   :  { %v341_v24 = vmul.f32 %v2174_v22, %v2496_v21 }
 0x12b   :  { %v342_v25 = vadd.f32 %v2498_v23, %v341_v24 }
 0x12d   :  { %345 = vrot.lane.b32.xlu0 %v342_v25, %s2337_s26  ;;  %v343_v28 = vmul.f32 0.0, %v342_v25 }
 0x19f   :  { %v346_v26 = vpop.permute.xlu0 %345 }
 0x1a0   :  { %v348_v27 = vmul.f32 %v346_v26, %v342_v25 }
 0x1a2   :  { %350 = vrot.lane.b32.xlu0 %v348_v27, %s2338_s2 }
 0x214   :  { %v351_v29 = vpop.permute.xlu0 %350 }
 0x215   :  { %v2504_v30 = vadd.f32 %v351_v29, %v343_v28 }
 0x217   :  { %2175 = vtanh.f32 %v2504_v30 }
 0x221   :  { %v2176_v33 = vpop.eup %2175 }
 0x222   :  { %356 = vrot.lane.b32.xlu1 %v2176_v33, %s2337_s26 }
 0x294   :  { %v357_v34 = vpop.permute.xlu1 %356 }
 0x295   :  { %v359_v35 = vmul.f32 %v357_v34, %v342_v25 }
 0x297   :  { %v360_v36 = vpack.c.bf16 %v359_v35, %v359_v35 }
 0x299   :  { %366 = vrot.lane.b32.xlu1 %v360_v36, %s2338_s2 }
 0x30b   :  { %v367_v37 = vpop.permute.xlu1 %366 }
 0x30c   :  { %1932 = vmatmul.mubr.msk.bf16.vlgmr.msra.gmra.mrb[0].mxu1 %vm238_vm3, %v367_v37 }
 0x30d   :  { %1960 = vmatpush3.bf16.msra.mxu1 %v2442_v1  ;;  %1963 = vmatprep.mubr.msk.bf16.mxu1 %vm2335_vm0, %v2334_v0 }
 0x30e   :  { %1961 = vmatprep.subr.bf16.mxu1 %v2334_v0 }
 0x311   :  { %1962 = vmatpush3.bf16.msra.mxu1 %v2447_v2 }
 0x312   :  { %1967 = vmatprep.subr.bf16.mxu1 %v2334_v0 }
 0x3df   :  { %v417_v39 = vpop.f32.mrb[0].mxu1 }
 0x3e0   :  { %v2111_v40 = vadd.f32 %v2533_v38, %v417_v39  ;;  %v1933_v41 = vpop.f32.mrb[1].mxu1 }
 0x3e1   :  { %v420_v42 = vpop.f32.mrb[2].mxu1 }
 0x3e2   :  { %2177 = vtanh.f32 %v2111_v40  ;;  %v1934_v43 = vpop.f32.mrb[3].mxu1 }
 0x3ec   :  { %v2178_v44 = vpop.eup %2177 }
 0x3ed   :  { %v425_v45 = vmul.f32 %v2178_v44, %v2496_v21 }
 0x3ef   :  { %v426_v46 = vadd.f32 %v2498_v23, %v425_v45 }
 0x3f1   :  { %429 = vrot.lane.b32.xlu0 %v426_v46, %s2337_s26  ;;  %v427_v49 = vmul.f32 0.0, %v426_v46 }
 0x463   :  { %v430_v47 = vpop.permute.xlu0 %429 }
 0x464   :  { %v432_v48 = vmul.f32 %v430_v47, %v426_v46 }
 0x466   :  { %434 = vrot.lane.b32.xlu1 %v432_v48, %s2338_s2 }
 0x4d8   :  { %v435_v50 = vpop.permute.xlu1 %434 }
 0x4d9   :  { %v2540_v51 = vadd.f32 %v435_v50, %v427_v49  ;;  %v171_v49 = vadd.f32 %v2484_v10, %v2493_v14 }
 0x4db   :  { %2179 = vtanh.f32 %v2540_v51 }
 0x4e5   :  { %v2180_v54 = vpop.eup %2179 }
 0x4e6   :  { %440 = vrot.lane.b32.xlu0 %v2180_v54, %s2337_s26 }
 0x558   :  { %v441_v55 = vpop.permute.xlu0 %440 }
 0x559   :  { %v443_v56 = vmul.f32 %v441_v55, %v426_v46 }
 0x55b   :  { %v444_v57 = vpack.c.bf16 %v443_v56, %v443_v56 }
 0x55d   :  { %446 = vrot.lane.b32.xlu1 %v444_v57, %s2338_s2 }
 0x5cf   :  { %v447_v62 = vpop.permute.xlu1 %446 }
 0x5d0   :  { %1940 = vmatmul.mubr.msk.bf16.vlgmr.msra.gmra.mrb[8].mxu0 %vm238_vm3, %v447_v62 }
 0x5d1   :  { %1944 = vmatpush3.bf16.msra.mxu0 %v2462_v7  ;;  %1947 = vmatprep.mubr.msk.bf16.mxu0 %vm2335_vm0, %v2334_v0 }
 0x5d2   :  { %1945 = vmatprep.subr.bf16.mxu0 %v2334_v0 }
 0x5d5   :  { %1946 = vmatpush3.bf16.msra.mxu0 %v2473_v9 }
 0x5d6   :  { %1951 = vmatprep.subr.bf16.mxu0 %v2334_v0 }
 0x5d8   :  { %1948 = vmatmul.mubr.msk.bf16.vlgmr.msra.gmra.mrb[12].mxu0 %vm238_vm3, %v367_v37 }
 0x5d9   :  { %1952 = vmatpush3.bf16.msra.mxu0 %v2510_v31  ;;  %1955 = vmatprep.mubr.msk.bf16.mxu0 %vm2335_vm0, %v2334_v0 }
 0x5da   :  { %1953 = vmatprep.subr.bf16.mxu0 %v2334_v0 }
 0x5dd   :  { %1954 = vmatpush3.bf16.msra.mxu0 %v2516_v32 }
 0x5de   :  { %1983 = vmatprep.subr.bf16.mxu0 %v2334_v0 }
 0x6ab   :  { %v527_v3 = vpop.f32.mrb[12].mxu0 }
 0x6ac   :  { %v533_v4 = vadd.f32 %v527_v3, %v166_v63  ;;  %v1949_v5 = vpop.f32.mrb[13].mxu0 }
 0x6ad   :  { %v530_v6 = vpop.f32.mrb[14].mxu0 }
 0x6ae   :  { %2181 = vtanh.f32 %v533_v4  ;;  %v1950_v8 = vpop.f32.mrb[15].mxu0 }
 0x6b8   :  { %v2182_v11 = vpop.eup %2181 }
 0x6b9   :  { %v535_v15 = vmul.f32 %v2182_v11, %v2496_v21 }
 0x6bb   :  { %v536_v16 = vadd.f32 %v2498_v23, %v535_v15 }
 0x6bd   :  { %539 = vrot.lane.b32.xlu0 %v536_v16, %s2337_s26  ;;  %v537_v19 = vmul.f32 %v536_v16, %v2504_v30 }
 0x72f   :  { %v540_v17 = vpop.permute.xlu0 %539 }
 0x730   :  { %v542_v18 = vmul.f32 %v540_v17, %v536_v16 }
 0x732   :  { %544 = vrot.lane.b32.xlu1 %v542_v18, %s2338_s2 }
 0x7a4   :  { %v545_v13 = vpop.permute.xlu1 %544 }
 0x7a5   :  { %v2584_v20 = vadd.f32 %v545_v13, %v537_v19 }
 0x7a7   :  { %2183 = vtanh.f32 %v2584_v20 }
 0x7b1   :  { %v2184_v22 = vpop.eup %2183 }
 0x7b2   :  { %550 = vrot.lane.b32.xlu0 %v2184_v22, %s2337_s26 }
 0x824   :  { %v551_v24 = vpop.permute.xlu0 %550 }
 0x825   :  { %v553_v25 = vmul.f32 %v551_v24, %v536_v16 }
 0x827   :  { %v554_v26 = vpack.c.bf16 %v553_v25, %v553_v25 }
 0x829   :  { %556 = vrot.lane.b32.xlu1 %v554_v26, %s2338_s2 }
 0x89b   :  { %v557_v27 = vpop.permute.xlu1 %556 }
 0x89c   :  { %1956 = vmatmul.mubr.msk.bf16.vlgmr.msra.gmra.mrb[8].mxu0 %vm238_vm3, %v557_v27 }
 0x89d   :  { %1984 = vmatpush3.bf16.msra.mxu0 %v2442_v1  ;;  %1987 = vmatprep.mubr.msk.bf16.mxu0 %vm2335_vm0, %v2334_v0 }
 0x89e   :  { %1985 = vmatprep.subr.bf16.mxu0 %v2334_v0 }
 0x8a1   :  { %1986 = vmatpush3.bf16.msra.mxu0 %v2447_v2 }
 0x8a2   :  { %1991 = vmatprep.subr.bf16.mxu0 %v2334_v0 }
 0x96f   :  { %v595_v28 = vpop.f32.mrb[8].mxu0 }
 0x970   :  { %v2112_v29 = vadd.f32 %v2533_v38, %v595_v28  ;;  %v1957_v30 = vpop.f32.mrb[9].mxu0 }
 0x971   :  { %v598_v33 = vpop.f32.mrb[10].mxu0 }
 0x972   :  { %2185 = vtanh.f32 %v2112_v29  ;;  %v1958_v34 = vpop.f32.mrb[11].mxu0 }
 0x97c   :  { %v2186_v35 = vpop.eup %2185 }
 0x97d   :  { %v603_v36 = vmul.f32 %v2186_v35, %v2496_v21 }
 0x97f   :  { %v604_v37 = vadd.f32 %v2498_v23, %v603_v36 }
 0x981   :  { %607 = vrot.lane.b32.xlu0 %v604_v37, %s2337_s26  ;;  %v605_v41 = vmul.f32 %v604_v37, %v2540_v51 }
 0x9f3   :  { %v608_v39 = vpop.permute.xlu0 %607 }
 0x9f4   :  { %v610_v40 = vmul.f32 %v608_v39, %v604_v37 }
 0x9f6   :  { %612 = vrot.lane.b32.xlu1 %v610_v40, %s2338_s2 }
 0xa68   :  { %v613_v42 = vpop.permute.xlu1 %612 }
 0xa69   :  { %v2602_v43 = vadd.f32 %v613_v42, %v605_v41 }
 0xa6b   :  { %2187 = vtanh.f32 %v2602_v43 }
 0xa75   :  { %v2188_v44 = vpop.eup %2187 }
 0xa76   :  { %618 = vrot.lane.b32.xlu0 %v2188_v44, %s2337_s26 }
 0xae8   :  { %v619_v45 = vpop.permute.xlu0 %618 }
 0xae9   :  { %v621_v46 = vmul.f32 %v619_v45, %v604_v37  ;;  %v174_v37 = vadd.f32 %v2486_v12, %v2493_v14 }
 0xaeb   :  { %v622_v47 = vpack.c.bf16 %v621_v46, %v621_v46 }
 0xaed   :  { %624 = vrot.lane.b32.xlu1 %v622_v47, %s2338_s2 }
 0xb5f   :  { %v625_v48 = vpop.permute.xlu1 %624 }
 0xb60   :  { %1964 = vmatmul.mubr.msk.bf16.vlgmr.msra.gmra.mrb[8].mxu1 %vm238_vm3, %v625_v48 }
 0xb61   :  { %1968 = vmatpush3.bf16.msra.mxu1 %v2462_v7  ;;  %1971 = vmatprep.mubr.msk.bf16.mxu1 %vm2335_vm0, %v2334_v0 }
 0xb62   :  { %1969 = vmatprep.subr.bf16.mxu1 %v2334_v0 }
 0xb65   :  { %1970 = vmatpush3.bf16.msra.mxu1 %v2473_v9 }
 0xb66   :  { %1975 = vmatprep.subr.bf16.mxu1 %v2334_v0 }
 0xb68   :  { %1972 = vmatmul.mubr.msk.bf16.vlgmr.msra.gmra.mrb[12].mxu1 %vm238_vm3, %v557_v27 }
 0xb69   :  { %1976 = vmatpush3.bf16.msra.mxu1 %v2510_v31  ;;  %1979 = vmatprep.mubr.msk.bf16.mxu1 %vm2335_vm0, %v2334_v0 }
 0xb6a   :  { %1977 = vmatprep.subr.bf16.mxu1 %v2334_v0 }
 0xb6d   :  { %1978 = vmatpush3.bf16.msra.mxu1 %v2516_v32 }
 0xb6e   :  { %2007 = vmatprep.subr.bf16.mxu1 %v2334_v0 }
 0xc3b   :  { %v705_v50 = vpop.f32.mrb[12].mxu1 }
 0xc3c   :  { %v711_v51 = vadd.f32 %v705_v50, %v171_v49  ;;  %v1973_v52 = vpop.f32.mrb[13].mxu1 }
 0xc3d   :  { %v708_v53 = vpop.f32.mrb[14].mxu1 }
 0xc3e   :  { %2189 = vtanh.f32 %v711_v51  ;;  %v1974_v54 = vpop.f32.mrb[15].mxu1 }
 0xc48   :  { %v2190_v55 = vpop.eup %2189 }
 0xc49   :  { %v713_v56 = vmul.f32 %v2190_v55, %v2496_v21 }
 0xc4b   :  { %v714_v57 = vadd.f32 %v2498_v23, %v713_v56 }
 0xc4d   :  { %717 = vrot.lane.b32.xlu0 %v714_v57, %s2337_s26  ;;  %v715_v3 = vmul.f32 %v714_v57, %v2584_v20 }
 0xcbf   :  { %v718_v62 = vpop.permute.xlu0 %717 }
 0xcc0   :  { %v720_v63 = vmul.f32 %v718_v62, %v714_v57 }
 0xcc2   :  { %722 = vrot.lane.b32.xlu1 %v720_v63, %s2338_s2 }
 0xd34   :  { %v723_v10 = vpop.permute.xlu1 %722 }
 0xd35   :  { %v2628_v4 = vadd.f32 %v723_v10, %v715_v3 }
 0xd37   :  { %2191 = vtanh.f32 %v2628_v4 }
 0xd41   :  { %v2192_v5 = vpop.eup %2191 }
 0xd42   :  { %728 = vrot.lane.b32.xlu0 %v2192_v5, %s2337_s26 }
 0xdb4   :  { %v729_v6 = vpop.permute.xlu0 %728 }
 0xdb5   :  { %v731_v8 = vmul.f32 %v729_v6, %v714_v57 }
 0xdb7   :  { %v732_v11 = vpack.c.bf16 %v731_v8, %v731_v8 }
 0xdb9   :  { %734 = vrot.lane.b32.xlu1 %v732_v11, %s2338_s2 }
 0xe2b   :  { %v735_v15 = vpop.permute.xlu1 %734 }
 0xe2c   :  { %1980 = vmatmul.mubr.msk.bf16.vlgmr.msra.gmra.mrb[8].mxu1 %vm238_vm3, %v735_v15 }
 0xe2d   :  { %2008 = vmatpush3.bf16.msra.mxu1 %v2442_v1  ;;  %2011 = vmatprep.mubr.msk.bf16.mxu1 %vm2335_vm0, %v2334_v0 }
 0xe2e   :  { %2009 = vmatprep.subr.bf16.mxu1 %v2334_v0 }
 0xe31   :  { %2010 = vmatpush3.bf16.msra.mxu1 %v2447_v2 }
 0xe32   :  { %2015 = vmatprep.subr.bf16.mxu1 %v2334_v0 }
 0xeff   :  { %v773_v16 = vpop.f32.mrb[8].mxu1 }
 0xf00   :  { %v2113_v17 = vadd.f32 %v2533_v38, %v773_v16  ;;  %v1981_v18 = vpop.f32.mrb[9].mxu1 }
 0xf01   :  { %v776_v19 = vpop.f32.mrb[10].mxu1 }
 0xf02   :  { %2193 = vtanh.f32 %v2113_v17  ;;  %v1982_v13 = vpop.f32.mrb[11].mxu1 }
 0xf0c   :  { %v2194_v20 = vpop.eup %2193 }
 0xf0d   :  { %v781_v22 = vmul.f32 %v2194_v20, %v2496_v21 }
 0xf0f   :  { %v782_v24 = vadd.f32 %v2498_v23, %v781_v22  ;;  %v179_v22 = vadd.f32 %v2493_v14, %v2557_v59 }
 0xf11   :  { %785 = vrot.lane.b32.xlu0 %v782_v24, %s2337_s26  ;;  %v783_v27 = vmul.f32 %v782_v24, %v2602_v43 }
 0xf83   :  { %v786_v25 = vpop.permute.xlu0 %785 }
 0xf84   :  { %v788_v26 = vmul.f32 %v786_v25, %v782_v24 }
 0xf86   :  { %790 = vrot.lane.b32.xlu1 %v788_v26, %s2338_s2 }
 0xff8   :  { %v791_v28 = vpop.permute.xlu1 %790 }
 0xff9   :  { %v2646_v29 = vadd.f32 %v791_v28, %v783_v27 }
 0xffb   :  { %2195 = vtanh.f32 %v2646_v29 }
0x1005   :  { %v2196_v30 = vpop.eup %2195 }
0x1006   :  { %796 = vrot.lane.b32.xlu0 %v2196_v30, %s2337_s26 }
0x1078   :  { %v797_v33 = vpop.permute.xlu0 %796 }
0x1079   :  { %v799_v34 = vmul.f32 %v797_v33, %v782_v24 }
0x107b   :  { %v800_v35 = vpack.c.bf16 %v799_v34, %v799_v34 }
0x107d   :  { %802 = vrot.lane.b32.xlu1 %v800_v35, %s2338_s2 }
0x10ef   :  { %v803_v36 = vpop.permute.xlu1 %802 }
0x10f0   :  { %1988 = vmatmul.mubr.msk.bf16.vlgmr.msra.gmra.mrb[16].mxu0 %vm238_vm3, %v803_v36 }
0x10f1   :  { %1992 = vmatpush3.bf16.msra.mxu0 %v2462_v7  ;;  %1995 = vmatprep.mubr.msk.bf16.mxu0 %vm2335_vm0, %v2334_v0 }
0x10f2   :  { %1993 = vmatprep.subr.bf16.mxu0 %v2334_v0 }
0x10f5   :  { %1994 = vmatpush3.bf16.msra.mxu0 %v2473_v9 }
0x10f6   :  { %1999 = vmatprep.subr.bf16.mxu0 %v2334_v0 }
0x10f8   :  { %1996 = vmatmul.mubr.msk.bf16.vlgmr.msra.gmra.mrb[20].mxu0 %vm238_vm3, %v735_v15 }
0x10f9   :  { %2000 = vmatpush3.bf16.msra.mxu0 %v2510_v31  ;;  %2003 = vmatprep.mubr.msk.bf16.mxu0 %vm2335_vm0, %v2334_v0 }
0x10fa   :  { %2001 = vmatprep.subr.bf16.mxu0 %v2334_v0 }
0x10fd   :  { %2002 = vmatpush3.bf16.msra.mxu0 %v2516_v32 }
0x10fe   :  { %2031 = vmatprep.subr.bf16.mxu0 %v2334_v0 }
0x11cb   :  { %v883_v39 = vpop.f32.mrb[20].mxu0 }
0x11cc   :  { %v889_v40 = vadd.f32 %v883_v39, %v174_v37  ;;  %v1997_v41 = vpop.f32.mrb[21].mxu0 }
0x11cd   :  { %v886_v42 = vpop.f32.mrb[22].mxu0 }
0x11ce   :  { %2197 = vtanh.f32 %v889_v40  ;;  %v1998_v43 = vpop.f32.mrb[23].mxu0 }
0x11d8   :  { %v2198_v44 = vpop.eup %2197 }
0x11d9   :  { %v891_v45 = vmul.f32 %v2198_v44, %v2496_v21 }
0x11db   :  { %v892_v46 = vadd.f32 %v2498_v23, %v891_v45 }
0x11dd   :  { %895 = vrot.lane.b32.xlu0 %v892_v46, %s2337_s26  ;;  %v893_v49 = vmul.f32 %v892_v46, %v2628_v4 }
0x124f   :  { %v896_v47 = vpop.permute.xlu0 %895 }
0x1250   :  { %v898_v48 = vmul.f32 %v896_v47, %v892_v46 }
0x1252   :  { %900 = vrot.lane.b32.xlu1 %v898_v48, %s2338_s2 }
0x12c4   :  { %v901_v12 = vpop.permute.xlu1 %900 }
0x12c5   :  { %v2672_v50 = vadd.f32 %v901_v12, %v893_v49 }
0x12c7   :  { %2199 = vtanh.f32 %v2672_v50 }
0x12d1   :  { %v2200_v51 = vpop.eup %2199 }
0x12d2   :  { %906 = vrot.lane.b32.xlu0 %v2200_v51, %s2337_s26 }
0x1344   :  { %v907_v52 = vpop.permute.xlu0 %906 }
0x1345   :  { %v909_v53 = vmul.f32 %v907_v52, %v892_v46 }
0x1347   :  { %v910_v54 = vpack.c.bf16 %v909_v53, %v909_v53 }
0x1349   :  { %912 = vrot.lane.b32.xlu1 %v910_v54, %s2338_s2 }
0x13bb   :  { %v913_v55 = vpop.permute.xlu1 %912 }
0x13bc   :  { %2004 = vmatmul.mubr.msk.bf16.vlgmr.msra.gmra.mrb[16].mxu0 %vm238_vm3, %v913_v55 }
0x13bd   :  { %2032 = vmatpush3.bf16.msra.mxu0 %v2442_v1  ;;  %2035 = vmatprep.mubr.msk.bf16.mxu0 %vm2335_vm0, %v2334_v0 }
0x13be   :  { %2033 = vmatprep.subr.bf16.mxu0 %v2334_v0 }
0x13c1   :  { %2034 = vmatpush3.bf16.msra.mxu0 %v2447_v2 }
0x13c2   :  { %2039 = vmatprep.subr.bf16.mxu0 %v2334_v0 }
0x148f   :  { %v951_v56 = vpop.f32.mrb[16].mxu0 }
0x1490   :  { %v2114_v57 = vadd.f32 %v2533_v38, %v951_v56  ;;  %v2005_v62 = vpop.f32.mrb[17].mxu0 }
0x1491   :  { %v954_v63 = vpop.f32.mrb[18].mxu0 }
0x1492   :  { %2201 = vtanh.f32 %v2114_v57  ;;  %v2006_v3 = vpop.f32.mrb[19].mxu0 }
0x149c   :  { %v2202_v10 = vpop.eup %2201 }
0x149d   :  { %v959_v4 = vmul.f32 %v2202_v10, %v2496_v21  ;;  %v182_v10 = vadd.f32 %v2493_v14, %v2561_v61 }
0x149f   :  { %v960_v5 = vadd.f32 %v2498_v23, %v959_v4 }
0x14a1   :  { %963 = vrot.lane.b32.xlu0 %v960_v5, %s2337_s26  ;;  %v961_v11 = vmul.f32 %v960_v5, %v2646_v29 }
0x1513   :  { %v964_v6 = vpop.permute.xlu0 %963 }
0x1514   :  { %v966_v8 = vmul.f32 %v964_v6, %v960_v5 }
0x1516   :  { %968 = vrot.lane.b32.xlu1 %v966_v8, %s2338_s2 }
0x1588   :  { %v969_v15 = vpop.permute.xlu1 %968 }
0x1589   :  { %v2690_v16 = vadd.f32 %v969_v15, %v961_v11 }
0x158b   :  { %2203 = vtanh.f32 %v2690_v16 }
0x1595   :  { %v2204_v17 = vpop.eup %2203 }
0x1596   :  { %974 = vrot.lane.b32.xlu0 %v2204_v17, %s2337_s26 }
0x1608   :  { %v975_v18 = vpop.permute.xlu0 %974 }
0x1609   :  { %v977_v19 = vmul.f32 %v975_v18, %v960_v5 }
0x160b   :  { %v978_v13 = vpack.c.bf16 %v977_v19, %v977_v19 }
0x160d   :  { %980 = vrot.lane.b32.xlu1 %v978_v13, %s2338_s2 }
0x167f   :  { %v981_v20 = vpop.permute.xlu1 %980 }
0x1680   :  { %2012 = vmatmul.mubr.msk.bf16.vlgmr.msra.gmra.mrb[16].mxu1 %vm238_vm3, %v981_v20 }
0x1681   :  { %2016 = vmatpush3.bf16.msra.mxu1 %v2462_v7  ;;  %2019 = vmatprep.mubr.msk.bf16.mxu1 %vm2335_vm0, %v2334_v0 }
0x1682   :  { %2017 = vmatprep.subr.bf16.mxu1 %v2334_v0 }
0x1685   :  { %2018 = vmatpush3.bf16.msra.mxu1 %v2473_v9 }
0x1686   :  { %2023 = vmatprep.subr.bf16.mxu1 %v2334_v0 }
0x1688   :  { %2020 = vmatmul.mubr.msk.bf16.vlgmr.msra.gmra.mrb[20].mxu1 %vm238_vm3, %v913_v55 }
0x1689   :  { %2024 = vmatpush3.bf16.msra.mxu1 %v2510_v31  ;;  %2027 = vmatprep.mubr.msk.bf16.mxu1 %vm2335_vm0, %v2334_v0 }
0x168a   :  { %2025 = vmatprep.subr.bf16.mxu1 %v2334_v0 }
0x168d   :  { %2026 = vmatpush3.bf16.msra.mxu1 %v2516_v32 }
0x168e   :  { %2055 = vmatprep.subr.bf16.mxu1 %v2334_v0 }
0x175b   :  { %v1061_v24 = vpop.f32.mrb[20].mxu1 }
0x175c   :  { %v1067_v25 = vadd.f32 %v1061_v24, %v179_v22  ;;  %v2021_v26 = vpop.f32.mrb[21].mxu1 }
0x175d   :  { %v1064_v27 = vpop.f32.mrb[22].mxu1 }
0x175e   :  { %2205 = vtanh.f32 %v1067_v25  ;;  %v2022_v28 = vpop.f32.mrb[23].mxu1 }
0x1768   :  { %v2206_v29 = vpop.eup %2205 }
0x1769   :  { %v1069_v30 = vmul.f32 %v2206_v29, %v2496_v21 }
0x176b   :  { %v1070_v33 = vadd.f32 %v2498_v23, %v1069_v30 }
0x176d   :  { %1073 = vrot.lane.b32.xlu0 %v1070_v33, %s2337_s26  ;;  %v1071_v36 = vmul.f32 %v1070_v33, %v2672_v50 }
0x17df   :  { %v1074_v34 = vpop.permute.xlu0 %1073 }
0x17e0   :  { %v1076_v35 = vmul.f32 %v1074_v34, %v1070_v33 }
0x17e2   :  { %1078 = vrot.lane.b32.xlu1 %v1076_v35, %s2338_s2 }
0x1854   :  { %v1079_v59 = vpop.permute.xlu1 %1078 }
0x1855   :  { %v2716_v37 = vadd.f32 %v1079_v59, %v1071_v36 }
0x1857   :  { %2207 = vtanh.f32 %v2716_v37 }
0x1861   :  { %v2208_v39 = vpop.eup %2207 }
0x1862   :  { %1084 = vrot.lane.b32.xlu0 %v2208_v39, %s2337_s26 }
0x18d4   :  { %v1085_v40 = vpop.permute.xlu0 %1084 }
0x18d5   :  { %v1087_v41 = vmul.f32 %v1085_v40, %v1070_v33 }
0x18d7   :  { %v1088_v42 = vpack.c.bf16 %v1087_v41, %v1087_v41 }
0x18d9   :  { %1090 = vrot.lane.b32.xlu1 %v1088_v42, %s2338_s2 }
0x194b   :  { %v1091_v43 = vpop.permute.xlu1 %1090 }
0x194c   :  { %2028 = vmatmul.mubr.msk.bf16.vlgmr.msra.gmra.mrb[16].mxu1 %vm238_vm3, %v1091_v43 }
0x194d   :  { %2056 = vmatpush3.bf16.msra.mxu1 %v2442_v1  ;;  %2059 = vmatprep.mubr.msk.bf16.mxu1 %vm2335_vm0, %v2334_v0 }
0x194e   :  { %2057 = vmatprep.subr.bf16.mxu1 %v2334_v0 }
0x1951   :  { %2058 = vmatpush3.bf16.msra.mxu1 %v2447_v2 }
0x1952   :  { %2063 = vmatprep.subr.bf16.mxu1 %v2334_v0 }
0x1a1f   :  { %v1129_v44 = vpop.f32.mrb[16].mxu1 }
0x1a20   :  { %v2115_v45 = vadd.f32 %v2533_v38, %v1129_v44  ;;  %v2029_v46 = vpop.f32.mrb[17].mxu1 }
0x1a21   :  { %v1132_v47 = vpop.f32.mrb[18].mxu1  ;;  %v187_v46 = vadd.f32 %v2555_v58, %v2493_v14 }
0x1a22   :  { %2209 = vtanh.f32 %v2115_v45  ;;  %v2030_v48 = vpop.f32.mrb[19].mxu1 }
0x1a2c   :  { %v2210_v49 = vpop.eup %2209 }
0x1a2d   :  { %v1137_v12 = vmul.f32 %v2210_v49, %v2496_v21 }
0x1a2f   :  { %v1138_v50 = vadd.f32 %v2498_v23, %v1137_v12 }
0x1a31   :  { %1141 = vrot.lane.b32.xlu0 %v1138_v50, %s2337_s26  ;;  %v1139_v53 = vmul.f32 %v1138_v50, %v2690_v16 }
0x1aa3   :  { %v1142_v51 = vpop.permute.xlu0 %1141 }
0x1aa4   :  { %v1144_v52 = vmul.f32 %v1142_v51, %v1138_v50 }
0x1aa6   :  { %1146 = vrot.lane.b32.xlu1 %v1144_v52, %s2338_s2 }
0x1b18   :  { %v1147_v54 = vpop.permute.xlu1 %1146 }
0x1b19   :  { %v2734_v55 = vadd.f32 %v1147_v54, %v1139_v53 }
0x1b1b   :  { %2211 = vtanh.f32 %v2734_v55 }
0x1b25   :  { %v2212_v56 = vpop.eup %2211 }
0x1b26   :  { %1152 = vrot.lane.b32.xlu0 %v2212_v56, %s2337_s26 }
0x1b98   :  { %v1153_v57 = vpop.permute.xlu0 %1152 }
0x1b99   :  { %v1155_v62 = vmul.f32 %v1153_v57, %v1138_v50 }
0x1b9b   :  { %v1156_v63 = vpack.c.bf16 %v1155_v62, %v1155_v62 }
0x1b9d   :  { %1158 = vrot.lane.b32.xlu1 %v1156_v63, %s2338_s2 }
0x1c0f   :  { %v1159_v3 = vpop.permute.xlu1 %1158 }
0x1c10   :  { %2036 = vmatmul.mubr.msk.bf16.vlgmr.msra.gmra.mrb[24].mxu0 %vm238_vm3, %v1159_v3 }
0x1c11   :  { %2040 = vmatpush3.bf16.msra.mxu0 %v2462_v7  ;;  %2043 = vmatprep.mubr.msk.bf16.mxu0 %vm2335_vm0, %v2334_v0 }
0x1c12   :  { %2041 = vmatprep.subr.bf16.mxu0 %v2334_v0 }
0x1c15   :  { %2042 = vmatpush3.bf16.msra.mxu0 %v2473_v9 }
0x1c16   :  { %2047 = vmatprep.subr.bf16.mxu0 %v2334_v0 }
0x1c18   :  { %2044 = vmatmul.mubr.msk.bf16.vlgmr.msra.gmra.mrb[28].mxu0 %vm238_vm3, %v1091_v43 }
0x1c19   :  { %2048 = vmatpush3.bf16.msra.mxu0 %v2510_v31  ;;  %2051 = vmatprep.mubr.msk.bf16.mxu0 %vm2335_vm0, %v2334_v0 }
0x1c1a   :  { %2049 = vmatprep.subr.bf16.mxu0 %v2334_v0 }
0x1c1d   :  { %2050 = vmatpush3.bf16.msra.mxu0 %v2516_v32 }
0x1c1e   :  { %2079 = vmatprep.subr.bf16.mxu0 %v2334_v0 }
0x1ceb   :  { %v1239_v4 = vpop.f32.mrb[28].mxu0 }
0x1cec   :  { %v1245_v5 = vadd.f32 %v1239_v4, %v182_v10  ;;  %v2045_v6 = vpop.f32.mrb[29].mxu0 }
0x1ced   :  { %v1242_v8 = vpop.f32.mrb[30].mxu0 }
0x1cee   :  { %2213 = vtanh.f32 %v1245_v5  ;;  %v2046_v11 = vpop.f32.mrb[31].mxu0 }
0x1cf8   :  { %v2214_v15 = vpop.eup %2213 }
0x1cf9   :  { %v1247_v16 = vmul.f32 %v2214_v15, %v2496_v21 }
0x1cfb   :  { %v1248_v17 = vadd.f32 %v2498_v23, %v1247_v16 }
0x1cfd   :  { %1251 = vrot.lane.b32.xlu0 %v1248_v17, %s2337_s26  ;;  %v1249_v13 = vmul.f32 %v1248_v17, %v2716_v37 }
0x1d6f   :  { %v1252_v18 = vpop.permute.xlu0 %1251 }
0x1d70   :  { %v1254_v19 = vmul.f32 %v1252_v18, %v1248_v17 }
0x1d72   :  { %1256 = vrot.lane.b32.xlu1 %v1254_v19, %s2338_s2 }
0x1de4   :  { %v1257_v61 = vpop.permute.xlu1 %1256 }
0x1de5   :  { %v2760_v20 = vadd.f32 %v1257_v61, %v1249_v13 }
0x1de7   :  { %2215 = vtanh.f32 %v2760_v20 }
0x1df1   :  { %v2216_v22 = vpop.eup %2215 }
0x1df2   :  { %1262 = vrot.lane.b32.xlu0 %v2216_v22, %s2337_s26 }
0x1e64   :  { %v1263_v24 = vpop.permute.xlu0 %1262 }
0x1e65   :  { %v1265_v25 = vmul.f32 %v1263_v24, %v1248_v17 }
0x1e67   :  { %v1266_v26 = vpack.c.bf16 %v1265_v25, %v1265_v25 }
0x1e69   :  { %1268 = vrot.lane.b32.xlu1 %v1266_v26, %s2338_s2 }
0x1edb   :  { %v1269_v27 = vpop.permute.xlu1 %1268 }
0x1edc   :  { %2052 = vmatmul.mubr.msk.bf16.vlgmr.msra.gmra.mrb[24].mxu0 %vm238_vm3, %v1269_v27 }
0x1edd   :  { %2080 = vmatpush3.bf16.msra.mxu0 %v2442_v1  ;;  %2083 = vmatprep.mubr.msk.bf16.mxu0 %vm2335_vm0, %v2334_v0 }
0x1ede   :  { %2081 = vmatprep.subr.bf16.mxu0 %v2334_v0 }
0x1ee1   :  { %2082 = vmatpush3.bf16.msra.mxu0 %v2447_v2 }
0x1ee2   :  { %2087 = vmatprep.subr.bf16.mxu0 %v2334_v0 }
0x1faf   :  { %v1307_v28 = vpop.f32.mrb[24].mxu0 }
0x1fb0   :  { %v2116_v29 = vadd.f32 %v2533_v38, %v1307_v28  ;;  %v2053_v30 = vpop.f32.mrb[25].mxu0 }
0x1fb1   :  { %v1310_v33 = vpop.f32.mrb[26].mxu0 }
0x1fb2   :  { %2217 = vtanh.f32 %v2116_v29  ;;  %v2054_v34 = vpop.f32.mrb[27].mxu0 }
0x1fbc   :  { %v2218_v35 = vpop.eup %2217 }
0x1fbd   :  { %v1315_v36 = vmul.f32 %v2218_v35, %v2496_v21 }
0x1fbf   :  { %v1316_v1 = vadd.f32 %v2498_v23, %v1315_v36 }
0x1fc1   :  { %1319 = vrot.lane.b32.xlu0 %v1316_v1, %s2337_s26  ;;  %v1317_v2 = vmul.f32 %v1316_v1, %v2734_v55 }
0x2033   :  { %v1320_v59 = vpop.permute.xlu0 %1319 }
0x2034   :  { %v1322_v37 = vmul.f32 %v1320_v59, %v1316_v1 }
0x2036   :  { %1324 = vrot.lane.b32.xlu1 %v1322_v37, %s2338_s2 }
0x20a8   :  { %v1325_v39 = vpop.permute.xlu1 %1324 }
0x20a9   :  { %v1327_v40 = vadd.f32 %v1325_v39, %v1317_v2 }
0x20ab   :  { %2219 = vtanh.f32 %v1327_v40 }
0x20b5   :  { %v2220_v41 = vpop.eup %2219 }
0x20b6   :  { %1330 = vrot.lane.b32.xlu0 %v2220_v41, %s2337_s26 }
0x2128   :  { %v1331_v42 = vpop.permute.xlu0 %1330 }
0x2129   :  { %v1333_v43 = vmul.f32 %v1331_v42, %v1316_v1 }
0x212b   :  { %v1334_v44 = vpack.c.bf16 %v1333_v43, %v1333_v43 }
0x212d   :  { %1336 = vrot.lane.b32.xlu1 %v1334_v44, %s2338_s2 }
0x219f   :  { %v1337_v45 = vpop.permute.xlu1 %1336 }
0x21a0   :  { %2060 = vmatmul.mubr.msk.bf16.vlgmr.msra.gmra.mrb[24].mxu1 %vm238_vm3, %v1337_v45 }
0x21a1   :  { %2064 = vmatpush3.bf16.msra.mxu1 %v2462_v7  ;;  %2067 = vmatprep.mubr.msk.bf16.mxu1 %vm2335_vm0, %v2334_v0 }
0x21a2   :  { %2065 = vmatprep.subr.bf16.mxu1 %v2334_v0 }
0x21a5   :  { %2066 = vmatpush3.bf16.msra.mxu1 %v2473_v9 }
0x21a6   :  { %2071 = vmatprep.subr.bf16.mxu1 %v2334_v0 }
0x21a8   :  { %2068 = vmatmul.mubr.msk.bf16.vlgmr.msra.gmra.mrb[28].mxu1 %vm238_vm3, %v1269_v27 }
0x21a9   :  { %2072 = vmatpush3.bf16.msra.mxu1 %v2510_v31  ;;  %2075 = vmatprep.mubr.msk.bf16.mxu1 %vm2335_vm0, %v2334_v0 }
0x21aa   :  { %2073 = vmatprep.subr.bf16.mxu1 %v2334_v0 }
0x21ad   :  { %2074 = vmatpush3.bf16.msra.mxu1 %v2516_v32 }
0x21ae   :  { %2103 = vmatprep.subr.bf16.mxu1 %v2334_v0 }
0x227b   :  { %v1417_v47 = vpop.f32.mrb[28].mxu1 }
0x227c   :  { %v1423_v48 = vadd.f32 %v1417_v47, %v187_v46  ;;  %v2069_v49 = vpop.f32.mrb[29].mxu1 }
0x227d   :  { %v1420_v12 = vpop.f32.mrb[30].mxu1 }
0x227e   :  { %2221 = vtanh.f32 %v1423_v48  ;;  %v2070_v50 = vpop.f32.mrb[31].mxu1 }
0x2288   :  { %v2222_v51 = vpop.eup %2221 }
0x2289   :  { %v1425_v52 = vmul.f32 %v2222_v51, %v2496_v21 }
0x228b   :  { %v1426_v53 = vadd.f32 %v2498_v23, %v1425_v52 }
0x228d   :  { %1429 = vrot.lane.b32.xlu0 %v1426_v53, %s2337_s26  ;;  %v1427_v56 = vmul.f32 %v1426_v53, %v2760_v20 }
0x22ff   :  { %v1430_v54 = vpop.permute.xlu0 %1429 }
0x2300   :  { %v1432_v55 = vmul.f32 %v1430_v54, %v1426_v53 }
0x2302   :  { %1434 = vrot.lane.b32.xlu1 %v1432_v55, %s2338_s2 }
0x2374   :  { %v1435_v58 = vpop.permute.xlu1 %1434 }
0x2375   :  { %v1437_v57 = vadd.f32 %v1435_v58, %v1427_v56 }
0x2377   :  { %2223 = vtanh.f32 %v1437_v57 }
0x2381   :  { %v2224_v62 = vpop.eup %2223 }
0x2382   :  { %1440 = vrot.lane.b32.xlu0 %v2224_v62, %s2337_s26 }
0x23f4   :  { %v1441_v63 = vpop.permute.xlu0 %1440 }
0x23f5   :  { %v1443_v3 = vmul.f32 %v1441_v63, %v1426_v53 }
0x23f7   :  { %v1444_v10 = vpack.c.bf16 %v1443_v3, %v1443_v3 }
0x23f9   :  { %1446 = vrot.lane.b32.xlu1 %v1444_v10, %s2338_s2 }
0x246b   :  { %v1447_v4 = vpop.permute.xlu1 %1446 }
0x246c   :  { %2076 = vmatmul.mubr.msk.bf16.vlgmr.msra.gmra.mrb[24].mxu1 %vm238_vm3, %v1447_v4 }
0x246d   :  { %2107 = vmatprep.mubr.msk.bf16.mxu1 %vm2335_vm0, %v2334_v0 }
0x253f   :  { %v1485_v5 = vpop.f32.mrb[24].mxu1 }
0x2540   :  { %v2117_v6 = vadd.f32 %v2533_v38, %v1485_v5  ;;  %v2077_v8 = vpop.f32.mrb[25].mxu1 }
0x2541   :  { %v1488_v11 = vpop.f32.mrb[26].mxu1 }
0x2542   :  { %2225 = vtanh.f32 %v2117_v6  ;;  %v2078_v15 = vpop.f32.mrb[27].mxu1 }
0x254c   :  { %v2226_v16 = vpop.eup %2225 }
0x254d   :  { %v1493_v17 = vmul.f32 %v2226_v16, %v2496_v21 }
0x254f   :  { %v1494_v18 = vadd.f32 %v2498_v23, %v1493_v17 }
0x2551   :  { %1497 = vrot.lane.b32.xlu0 %v1494_v18, %s2337_s26  ;;  %v1495_v61 = vmul.f32 %v1494_v18, %v1327_v40 }
0x25c3   :  { %v1498_v19 = vpop.permute.xlu0 %1497 }
0x25c4   :  { %v1500_v13 = vmul.f32 %v1498_v19, %v1494_v18 }
0x25c6   :  { %1502 = vrot.lane.b32.xlu1 %v1500_v13, %s2338_s2 }
0x2638   :  { %v1503_v20 = vpop.permute.xlu1 %1502 }
0x2639   :  { %v1505_v22 = vadd.f32 %v1503_v20, %v1495_v61 }
0x263b   :  { %2227 = vtanh.f32 %v1505_v22 }
0x2645   :  { %v2228_v24 = vpop.eup %2227 }
0x2646   :  { %1508 = vrot.lane.b32.xlu0 %v2228_v24, %s2337_s26 }
0x26b8   :  { %v1509_v25 = vpop.permute.xlu0 %1508 }
0x26b9   :  { %v1511_v26 = vmul.f32 %v1509_v25, %v1494_v18 }
0x26bb   :  { %v1512_v27 = vpack.c.bf16 %v1511_v26, %v1511_v26 }
0x26bd   :  { %1514 = vrot.lane.b32.xlu1 %v1512_v27, %s2338_s2 }
0x272f   :  { %v1515_v28 = vpop.permute.xlu1 %1514 }
0x2730   :  { %2084 = vmatmul.mubr.msk.bf16.vlgmr.msra.gmra.mrb[32].mxu0 %vm238_vm3, %v1515_v28 }
0x2731   :  { %2088 = vmatpush3.bf16.msra.mxu0 %v2462_v7  ;;  %2091 = vmatprep.mubr.msk.bf16.mxu0 %vm2335_vm0, %v2334_v0  ;;  %v190_v7 = vadd.f32 %v2559_v60, %v2493_v14 }
0x2732   :  { %2089 = vmatprep.subr.bf16.mxu0 %v2334_v0 }
0x2735   :  { %2090 = vmatpush3.bf16.msra.mxu0 %v2473_v9 }
0x2736   :  { %2095 = vmatprep.subr.bf16.mxu0 %v2334_v0 }
0x2738   :  { %2092 = vmatmul.mubr.msk.bf16.vlgmr.msra.gmra.mrb[36].mxu0 %vm238_vm3, %v1447_v4 }
0x2739   :  { %2096 = vmatpush3.bf16.msra.mxu0 %v2510_v31  ;;  %2099 = vmatprep.mubr.msk.bf16.mxu0 %vm2335_vm0, %v2334_v0 }
0x273a   :  { %2097 = vmatprep.subr.bf16.mxu0 %v2334_v0 }
0x273d   :  { %2098 = vmatpush3.bf16.msra.mxu0 %v2516_v32 }
0x280b   :  { %v1595_v29 = vpop.f32.mrb[36].mxu0 }
0x280c   :  { %v1601_v30 = vadd.f32 %v1595_v29, %v190_v7  ;;  %v2093_v33 = vpop.f32.mrb[37].mxu0 }
0x280d   :  { %v1598_v9 = vpop.f32.mrb[38].mxu0 }
0x280e   :  { %2229 = vtanh.f32 %v1601_v30  ;;  %v2094_v34 = vpop.f32.mrb[39].mxu0 }
0x2818   :  { %v2230_v35 = vpop.eup %2229 }
0x2819   :  { %v1603_v36 = vmul.f32 %v2230_v35, %v2496_v21 }
0x281b   :  { %v1604_v31 = vadd.f32 %v2498_v23, %v1603_v36 }
0x281d   :  { %1607 = vrot.lane.b32.xlu0 %v1604_v31, %s2337_s26  ;;  %v1605_v32 = vmul.f32 %v1604_v31, %v1437_v57  ;;  %v1817_v57 = vld [vmem:[%s2875_s10] ss:$0 sm:$0xff] }
0x288f   :  { %v1608_v1 = vpop.permute.xlu0 %1607 }
0x2890   :  { %v1610_v59 = vmul.f32 %v1608_v1, %v1604_v31 }
0x2892   :  { %1612 = vrot.lane.b32.xlu1 %v1610_v59, %s2338_s2 }
0x2904   :  { %v1613_v37 = vpop.permute.xlu1 %1612 }
0x2905   :  { %v1615_v14 = vadd.f32 %v1613_v37, %v1605_v32 }
0x2907   :  { %2231 = vtanh.f32 %v1615_v14 }
0x2911   :  { %v2232_v60 = vpop.eup %2231 }
0x2912   :  { %1618 = vrot.lane.b32.xlu0 %v2232_v60, %s2337_s26 }
0x2984   :  { %v1619_v2 = vpop.permute.xlu0 %1618 }
0x2985   :  { %v1621_v39 = vmul.f32 %v1619_v2, %v1604_v31 }
0x2987   :  { %v1622_v40 = vpack.c.bf16 %v1621_v39, %v1621_v39 }
0x2989   :  { %1624 = vrot.lane.b32.xlu1 %v1622_v40, %s2338_s2 }
0x29fb   :  { %v1625_v41 = vpop.permute.xlu1 %1624 }
0x29fc   :  { %2100 = vmatmul.mubr.msk.bf16.vlgmr.msra.gmra.mrb[32].mxu0 %vm238_vm3, %v1625_v41 }
0x2acf   :  { %v1663_v42 = vpop.f32.mrb[32].mxu0 }
0x2ad0   :  { %v2118_v43 = vadd.f32 %v2533_v38, %v1663_v42  ;;  %v2101_v44 = vpop.f32.mrb[33].mxu0  ;;  %v2171_v38 = vld [vmem:[%s2874_s9] sm:$0xff]  }
0x2ad1   :  { %v1666_v45 = vpop.f32.mrb[34].mxu0  ;;  %2104 = vmatpush3.bf16.msra.mxu1 %v2171_v38 }
0x2ad2   :  { %2233 = vtanh.f32 %v2118_v43  ;;  %v2102_v46 = vpop.f32.mrb[35].mxu0  ;;  %2105 = vmatprep.subr.bf16.mxu1 %v2334_v0 }
0x2adc   :  { %v2234_v47 = vpop.eup %2233 }
0x2add   :  { %v1671_v48 = vmul.f32 %v2234_v47, %v2496_v21  ;;  %v2172_v21 = vld [vmem:[%s2874_s9 + $0x8] sm:$0xff]   ;;  %s1767_s9 = sshll.u32 %s2339_s8, 4  ;;  %s1768_s9 = int_to_ptr.vmem [resolvable:$true] %s1767_s9 }
0x2ade   :  { %2106 = vmatpush3.bf16.msra.mxu1 %v2172_v21  ;;  %s2303_s21 = scalar_lea.vmem %s1768_s9, 128  ;;  %p2308_p11 = scmp.lt.s32.totalorder %s1768_s9, %s1768_s9 }
0x2adf   :  { %v1672_v49 = vadd.f32 %v2498_v23, %v1671_v48  ;;  %p2304_p10 = scmp.ne.s32.totalorder %s1768_s9, %s2303_s21  ;;  %p2309_p12 = scmp.lt.s32.totalorder %s2303_s21, %s2303_s21 }
0x2ae1   :  { %1675 = vrot.lane.b32.xlu0 %v1672_v49, %s2337_s26  ;;  %v1673_v51 = vmul.f32 %v1672_v49, %v1505_v22  ;;  %p2310_p13 = por %p2309_p12, %p2308_p11 }
0x2ae3   :  { %p2311_p0 = pnand %p2310_p13, %p2304_p10 }
0x2b53   :  { %v1676_v12 = vpop.permute.xlu0 %1675 }
0x2b54   :  { %v1678_v50 = vmul.f32 %v1676_v12, %v1672_v49 }
0x2b56   :  { %1680 = vrot.lane.b32.xlu1 %v1678_v50, %s2338_s2 }
0x2bc8   :  { %v1681_v52 = vpop.permute.xlu1 %1680 }
0x2bc9   :  { %v1683_v53 = vadd.f32 %v1681_v52, %v1673_v51 }
0x2bcb   :  { %2235 = vtanh.f32 %v1683_v53 }
0x2bd5   :  { %v2236_v23 = vpop.eup %2235 }
0x2bd6   :  { %1686 = vrot.lane.b32.xlu0 %v2236_v23, %s2337_s26 }
0x2c48   :  { %v1687_v54 = vpop.permute.xlu0 %1686 }
0x2c49   :  { %v1689_v55 = vmul.f32 %v1687_v54, %v1672_v49 }
0x2c4b   :  { %v1690_v56 = vpack.c.bf16 %v1689_v55, %v1689_v55 }
0x2c4d   :  { %1703 = vrot.lane.b32.xlu1 %v1690_v56, %s2338_s2 }
0x2cbf   :  { %v1704_v58 = vpop.permute.xlu1 %1703 }
0x2cc0   :  { %2108 = vmatmul.mubr.msk.bf16.vlgmr.msra.gmra.mrb[32].mxu1 %vm238_vm3, %v1704_v58 }
0x2d93   :  { %v1754_v62 = vpop.f32.mrb[32].mxu1 }
0x2d94   :  { %v1755_v0 = vadd.f32 %v1817_v57, %v1754_v62  ;;  %v2109_v63 = vpop.f32.mrb[33].mxu1 }
0x2d95   :  { %v1757_v3 = vpop.f32.mrb[34].mxu1 }
0x2d96   :  { %1760 = vst [vmem:[#allocation9] sm:$0xff] %v1755_v0  ;;  %v2110_v10 = vpop.f32.mrb[35].mxu1 }
0x2d97   :  { %2314 = shalt.err (!%p2311_p0)
}
0x2d98   :  { %s2315_s10 = scalar_lea.hbm %s2876_s11, 128 }
0x2d99   :  { %p2316_p1 = scmp.ne.s32.totalorder %s2876_s11, %s2315_s10  ;;  %p2319_p2 = scmp.lt.u32.totalorder %s2315_s10, %s2876_s11 }
0x2d9b   :  { %p2321_p3 = pnand %p2319_p2, %p2316_p1 }
0x2d9d   :  { %2324 = shalt.err (!%p2321_p3)
}
0x2d9e   :  { %1770 = dma.vmem_to_hbm [thread:$0]  %s1768_s9, 128, %s2876_s11, [#allocation5]  }
0x2d9f   :  { %2329 = dma.done.wait [#allocation5], 128  }
0x2da0   :  { %2330 = vsyncadd [#allocation5], 4294967168 }
0x2da1   :  { %1774 = vsyncpa [#allocation4], 1 }
0x2da2   :  { %1775 = vsyncpa [#allocation7], 1 }
0x2da3   :  { %1776 = vsyncpa [#allocation5], 1 }

</bundles_post_ra>
